<compile_context>
chip_gen: v6e
topology: v6e:2x2x1
jax: 0.10.0
libtpu: 0.0.40
codegen_flags: <defaults>
</compile_context>

<pallas_src>
import functools
import math

import jax
import jax.numpy as jnp
from jax.experimental import pallas as pl
from jax.experimental.pallas import tpu as pltpu


def _scale_norm_kernel(g_ref, s_ref, x_ref, o_ref, *, eps, seg):
    """Process one (tm, w) tile.

    Each physical row packs w // seg logical rows of length `seg`; the L2 norm
    is taken independently per seg-wide lane segment.  g_ref is a (1,) SMEM
    scalar; s_ref is the resident (w, k) one-hot segment matrix.
    """
    x = x_ref[...].astype(jnp.float32)                       # (tm, w)
    g = g_ref[0]
    eps2 = eps * eps

    if seg == x.shape[-1]:
        # Lane axis == feature axis: plain per-row reduction.
        ss = jnp.sum(x * x, axis=-1, keepdims=True)          # (tm, 1)
        scale = g * jax.lax.rsqrt(jnp.maximum(ss, eps2))     # (tm, 1)
        o_ref[...] = (x * scale).astype(o_ref.dtype)
    else:
        s_mat = s_ref[...]                                    # (w, k) one-hot
        hi = jax.lax.Precision.HIGHEST
        # Per-segment sum of squares on the otherwise idle MXU.  HIGHEST keeps
        # x*x (and scale below) from being rounded to bf16 in the MXU.
        ss = jnp.dot(x * x, s_mat, precision=hi,
                     preferred_element_type=jnp.float32)      # (tm, k)
        scale = g * jax.lax.rsqrt(jnp.maximum(ss, eps2))      # (tm, k)
        # Broadcast each segment's scale across its seg lanes by contracting
        # against the SAME one-hot matrix (no second mask needed).
        scale_b = jax.lax.dot_general(
            scale, s_mat, (((1,), (1,)), ((), ())),
            precision=hi, preferred_element_type=jnp.float32)  # (tm, w)
        o_ref[...] = (x * scale_b).astype(o_ref.dtype)


def scale_norm(x, g, eps=1e-5):
    """out = x / max(||x||_2 along last axis, eps) * g   (g: scalar param)."""
    orig_shape = x.shape
    dim = orig_shape[-1]
    x2 = x.reshape(-1, dim)
    m = x2.shape[0]

    # ---- lane packing: lane axis must be a multiple of 128 (<= 512) --------
    if dim % 128 == 0:
        k = 1
    else:
        k = 128 // math.gcd(dim, 128)          # smallest k with k*dim % 128 == 0
        while 2 * k * dim <= 512 and 2 * k <= max(m, 1):
            k *= 2                             # widen toward 512 lanes
    w = k * dim

    # Zero-pad the row count so packing ALWAYS applies (no lane-sparse
    # fallback).  Zero rows give ss=0 -> finite scale -> output 0; harmless and
    # sliced away below.
    m_pad = -(-m // k) * k
    if m_pad != m:
        x2 = jnp.pad(x2, ((0, m_pad - m), (0, 0)))
    mp = m_pad // k
    xp = x2.reshape(mp, w)

    # One-hot segment matrix (w, k): column j selects lanes [j*dim, (j+1)*dim).
    lane = jnp.arange(w, dtype=jnp.int32)[:, None]
    col = jnp.arange(k, dtype=jnp.int32)[None, :]
    s_mat = (lane // dim == col).astype(jnp.float32)

    # ---- row tile: fill an explicit VMEM budget -----------------------------
    itemsize = jnp.dtype(x.dtype).itemsize
    sublane = max(8, 32 // itemsize)           # 8 f32 / 16 bf16 / 32 int8,fp8
    # Per-step accounting: 2 double-buffered I/O arrays at the input dtype
    # (4 * tm*w*itemsize) plus ~4 f32 in-kernel intermediates (x cast, x*x,
    # scale_b, pre-cast product).  40 MiB accounted + 48 MiB scoped limit stays
    # well inside v7x's 64 MiB physical VMEM; v5e/v6e (128 MiB) have headroom.
    vmem_budget = 40 * 1024 * 1024
    bytes_per_row = w * (4 * itemsize + 4 * 4)
    tm_max = max((vmem_budget // bytes_per_row) // sublane * sublane, sublane)

    if mp <= sublane:
        tm = mp                                # single full-extent block
    else:
        # >= 2 (even) grid steps so the "parallel" axis shards across both
        # v7x TensorCores and stays balanced.
        steps = max(-(-mp // tm_max), 2)
        if steps % 2:
            steps += 1
        tm = -(-mp // steps)
        tm = -(-tm // sublane) * sublane       # round up to sublane packing
    # NOTE: the remainder grid block may read past the end of xp (garbage
    # rows); every row is independent and Pallas masks out-of-bounds writes,
    # so garbage cannot contaminate valid output rows.
    grid = pl.cdiv(mp, tm)

    g1 = jnp.asarray(g, jnp.float32).reshape(1)

    out_p = pl.pallas_call(
        functools.partial(_scale_norm_kernel, eps=float(eps), seg=dim),
        out_shape=jax.ShapeDtypeStruct((mp, w), x.dtype),
        grid_spec=pltpu.PrefetchScalarGridSpec(
            num_scalar_prefetch=0,
            grid=(grid,),
            in_specs=[
                pl.BlockSpec(memory_space=pltpu.MemorySpace.SMEM),  # g scalar
                pl.BlockSpec((w, k), lambda i: (0, 0)),   # resident one-hot
                pl.BlockSpec((tm, w), lambda i: (i, 0)),  # x row tile
            ],
            out_specs=pl.BlockSpec((tm, w), lambda i: (i, 0)),
        ),
        compiler_params=pltpu.CompilerParams(
            dimension_semantics=("parallel",),
            vmem_limit_bytes=48 * 1024 * 1024,
        ),
        cost_estimate=pl.CostEstimate(
            flops=2 * m_pad * dim + (12 * m_pad * dim * k if k > 1 else 0),
            transcendentals=m_pad,
            bytes_accessed=2 * m_pad * dim * itemsize + w * k * 4 + 4,
        ),
    )(g1, s_mat, xp)

    out = out_p.reshape(m_pad, dim)
    if m_pad != m:
        out = out[:m]
    return out.reshape(orig_shape)


def _scale_norm_ref(x, g, eps=1e-5):
    n = jnp.maximum(jnp.linalg.norm(x, axis=-1, keepdims=True), eps)
    return x / n * g


if __name__ == "__main__":
    key = jax.random.PRNGKey(0)
    kx, kg, kx2, kx3 = jax.random.split(key, 4)

    eps = 1e-5
    g_init = jnp.ones((1,), jnp.float32)                 # module __init__ value
    g_trained = 1.0 + 0.1 * jax.random.normal(kg, (1,), jnp.float32)

    # Token-sequence layout implied by the module: (batch, seq, dim).
    # dim=32 exercises the lane-packing path (k=16, w=512 lanes).
    x = jax.random.normal(kx, (2, 64, 32), dtype=jnp.float32)
    out = jax.block_until_ready(scale_norm(x, g_init, eps=eps))
    assert out.shape == x.shape
    assert jnp.allclose(out, _scale_norm_ref(x, g_init, eps), atol=1e-4, rtol=1e-4)

    out2 = jax.block_until_ready(scale_norm(x, g_trained, eps=eps))
    assert jnp.allclose(out2, _scale_norm_ref(x, g_trained, eps), atol=1e-4, rtol=1e-4)

    # Row count not divisible by the packing factor -> exercises row padding.
    x_odd = jax.random.normal(kx2, (3, 5, 32), dtype=jnp.float32)
    out3 = jax.block_until_ready(scale_norm(x_odd, g_trained, eps=eps))
    assert jnp.allclose(out3, _scale_norm_ref(x_odd, g_trained, eps), atol=1e-4, rtol=1e-4)

    # Already lane-aligned path (dim multiple of 128) with a 2-step grid.
    x128 = jax.random.normal(kx3, (2, 8, 128), dtype=jnp.float32)
    out4 = jax.block_until_ready(scale_norm(x128, g_trained, eps=eps))
    assert jnp.allclose(out4, _scale_norm_ref(x128, g_trained, eps), atol=1e-4, rtol=1e-4)

    print("KERNEL_OK")
</pallas_src>

<mosaic_0001>
module attributes {stable_mosaic.version = 11 : i64} {
  func.func @_scale_norm_kernel(%arg0: i32, %arg1: memref<1xf32, #tpu.memory_space<smem>>, %arg2: memref<512x16xf32, #tpu.memory_space<vmem>>, %arg3: memref<8x512xf32, #tpu.memory_space<vmem>>, %arg4: memref<8x512xf32, #tpu.memory_space<vmem>>) attributes {dimension_semantics = [#tpu.dimension_semantics<parallel>], iteration_bounds = array<i64: 1>, scalar_prefetch = 0 : i64, scratch_operands = 0 : i64, tpu.core_type = #tpu.core_type<tc>, window_params = [{transform_indices = @transform_0, window_bounds = array<i64: 1>}, {pipeline_mode = #tpu.pipeline_mode<synchronous>, transform_indices = @transform_1, window_bounds = array<i64: 512, 16>}, {transform_indices = @transform_2, window_bounds = array<i64: 8, 512>}, {transform_indices = @transform_3, window_bounds = array<i64: 8, 512>}]} {
    %c0 = arith.constant 0 : index
    %c0_0 = arith.constant 0 : index
    %0 = vector.load %arg3[%c0, %c0_0] : memref<8x512xf32, #tpu.memory_space<vmem>>, vector<8x512xf32>
    %c0_1 = arith.constant 0 : index
    %1 = memref.load %arg1[%c0_1] : memref<1xf32, #tpu.memory_space<smem>>
    %c0_2 = arith.constant 0 : index
    %c0_3 = arith.constant 0 : index
    %2 = vector.load %arg2[%c0_2, %c0_3] : memref<512x16xf32, #tpu.memory_space<vmem>>, vector<512x16xf32>
    %3 = arith.mulf %0, %0 : vector<8x512xf32>
    %cst = arith.constant dense<0.000000e+00> : vector<8x16xf32>
    %4 = tpu.matmul %3, %2, %cst {dimension_numbers = #tpu.dot_dimension_numbers<[1], [0], [0], [1], [0, 0, 1, 1], [], []>, precision = #tpu.contract_precision<fp32>} : vector<8x512xf32>, vector<512x16xf32>, vector<8x16xf32> -> vector<8x16xf32>
    %cst_4 = arith.constant 1.000000e-10 : f32
    %5 = vector.broadcast %cst_4 : f32 to vector<8x16xf32>
    %6 = arith.maximumf %4, %5 : vector<8x16xf32>
    %7 = math.rsqrt %6 : vector<8x16xf32>
    %8 = vector.broadcast %1 : f32 to vector<8x16xf32>
    %9 = arith.mulf %8, %7 : vector<8x16xf32>
    %cst_5 = arith.constant dense<0.000000e+00> : vector<8x512xf32>
    %10 = tpu.matmul %9, %2, %cst_5 {dimension_numbers = #tpu.dot_dimension_numbers<[1], [1], [0], [0], [0, 0, 1, 0], [], []>, precision = #tpu.contract_precision<fp32>} : vector<8x16xf32>, vector<512x16xf32>, vector<8x512xf32> -> vector<8x512xf32>
    %11 = arith.mulf %0, %10 : vector<8x512xf32>
    %c0_6 = arith.constant 0 : index
    %c0_7 = arith.constant 0 : index
    %12 = vector.load %arg4[%c0_6, %c0_7] : memref<8x512xf32, #tpu.memory_space<vmem>>, vector<8x512xf32>
    tpu.vector_store %arg4[%c0_6, %c0_7], %11 {strides = array<i32>} : memref<8x512xf32, #tpu.memory_space<vmem>>, vector<8x512xf32>,
    return
  }
  func.func @transform_0(%arg0: i32) -> i32 {
    %c0_i32 = arith.constant 0 : i32
    %c0_i32_0 = arith.constant 0 : i32
    return %c0_i32 : i32
  }
  func.func @transform_1(%arg0: i32) -> (i32, i32) {
    %c0_i32 = arith.constant 0 : i32
    %c0_i32_0 = arith.constant 0 : i32
    %c0_i32_1 = arith.constant 0 : i32
    return %c0_i32, %c0_i32_0 : i32, i32
  }
  func.func @transform_2(%arg0: i32) -> (i32, i32) {
    %c0_i32 = arith.constant 0 : i32
    %c0_i32_0 = arith.constant 0 : i32
    return %arg0, %c0_i32 : i32, i32
  }
  func.func @transform_3(%arg0: i32) -> (i32, i32) {
    %c0_i32 = arith.constant 0 : i32
    %c0_i32_0 = arith.constant 0 : i32
    return %arg0, %c0_i32 : i32, i32
  }
}

</mosaic_0001>

<bundles_post_ra>
// kernel: tpu_custom_call.1
= control target key start
LH: loop header
LB: loop body
LE: loop exit
PB: predicated region body
PF: predicated region fallthrough
CT: control target
= control target key end

     0   :  { %s7363_s0 = inlined_call_operand.<no memory space> [shape: f32[1], index: 0, kind: input, shape index: {}]   ;;  %s7364_s1 = inlined_call_operand.vmem [shape: f32[512,16], index: 1, kind: input, shape index: {}]   ;;  %s7365_s2 = inlined_call_operand.vmem [shape: f32[8,512], index: 2, kind: input, shape index: {}]   ;;  %s7366_s3 = inlined_call_operand.hbm [shape: f32[8,512], index: 3, kind: output, shape index: {}]  }
   0x1   :  { %v52_v0 = vld [vmem:[%s7364_s1 + $0xf8] sm:$0xff]  ;;  %v51_v2 = vld [vmem:[%s7364_s1 + $0xf0] sm:$0xff]  ;;  %v50_v7 = vld [vmem:[%s7364_s1 + $0xe8] sm:$0xff] }
   0x2   :  { %v36_v1 = vld [vmem:[%s7364_s1 + $0x78] sm:$0xff]  ;;  %v4696_v3 = vand.u32 4294901760, %v52_v0  ;;  %v4700_v5 = vand.u32 4294901760, %v51_v2  ;;  %v35_v6 = vld [vmem:[%s7364_s1 + $0x70] sm:$0xff]  ;;  %v34_v9 = vld [vmem:[%s7364_s1 + $0x68] sm:$0xff]  ;;  %v4717_v11 = vand.u32 4294901760, %v50_v7 }
   0x3   :  { %v4698_v4 = vand.u32 4294901760, %v36_v1  ;;  %v4708_v8 = vand.u32 4294901760, %v35_v6  ;;  %v49_v10 = vld [vmem:[%s7364_s1 + $0xe0] sm:$0xff]  ;;  %v4723_v13 = vand.u32 4294901760, %v34_v9  ;;  %v48_v14 = vld [vmem:[%s7364_s1 + $0xd8] sm:$0xff]  ;;  %v4748_v20 = vld [vmem:[%s7364_s1 + $0xd0] sm:$0xff] }
   0x4   :  { %3745 = vmatprep.subr.mxu0 %v4696_v3  ;;  %v33_v12 = vld [vmem:[%s7364_s1 + $0x60] sm:$0xff]  ;;  %v4729_v15 = vand.u32 4294901760, %v49_v10  ;;  %v4732_v16 = vsub.f32 %v52_v0, %v4696_v3  ;;  %v4737_v17 = vld [vmem:[%s7364_s1 + $0x58] sm:$0xff]  ;;  %v4751_v21 = vsub.f32 %v51_v2, %v4700_v5  ;;  %v4754_v22 = vand.u32 4294901760, %v48_v14  ;;  %v4760_v24 = vld [vmem:[%s7364_s1 + $0x50] sm:$0xff] }
   0x5   :  { %3746 = vmatpush3.msra.mxu0 %v4698_v4  ;;  %v4740_v18 = vand.u32 4294901760, %v33_v12  ;;  %v4743_v19 = vsub.f32 %v36_v1, %v4698_v4  ;;  %v4763_v25 = vsub.f32 %v35_v6, %v4708_v8  ;;  %v4767_v26 = vand.u32 4294901760, %v4737_v17  ;;  %v4774_v29 = vld [vmem:[%s7364_s1 + $0xc8] sm:$0xff]  ;;  %v4808_v39 = vld [vmem:[%s7364_s1 + $0xc0] sm:$0xff]  ;;  %v4831_v49 = vld [vmem:[%s7364_s1 + $0xb8] sm:$0xff] }
   0x6   :  { %3747 = vmatprep.subr.mxu0 %v4700_v5  ;;  %7670 = vst [vmem:[#allocation6_spill] sm:$0xff] %v4732_v16  ;;  %v7381_v23 = vand.u32 4294901760, %v4732_v16  ;;  %v7378_v28 = vand.u32 4294901760, %v4751_v21  ;;  %v4781_v31 = vand.u32 4294901760, %v4748_v20  ;;  %v4785_v33 = vsub.f32 %v50_v7, %v4717_v11  ;;  %v4790_v34 = vld [vmem:[%s7364_s1 + $0x48] sm:$0xff]  ;;  %v4821_v44 = vld [vmem:[%s7364_s1 + $0x40] sm:$0xff] }
   0x7   :  { %3748 = vmatpush3.msra.mxu0 %v4708_v8  ;;  %v7380_v27 = vand.u32 4294901760, %v4743_v19  ;;  %v7377_v32 = vand.u32 4294901760, %v4763_v25  ;;  %v4800_v37 = vand.u32 4294901760, %v4760_v24  ;;  %v4803_v38 = vsub.f32 %v34_v9, %v4723_v13  ;;  %v4846_v54 = vld [vmem:[%s7364_s1 + $0x38] sm:$0xff]  ;;  %v4869_v62 = vld [vmem:[%s7364_s1 + $0xb0] sm:$0xff] }
   0x8   :  { %3749 = vmatprep.subr.mxu0 %v4717_v11  ;;  %v317_v30 = vsub.f32 %v4732_v16, %v7381_v23  ;;  %v324_v36 = vsub.f32 %v4751_v21, %v7378_v28  ;;  %v4815_v42 = vand.u32 4294901760, %v4774_v29  ;;  %v7375_v43 = vand.u32 4294901760, %v4785_v33  ;;  %v4874_v63 = vld [vmem:[%s7364_s1 + $0x30] sm:$0xff] }
   0x9   :  { %3750 = vmatpush3.msra.mxu0 %v4723_v13  ;;  %v205_v35 = vsub.f32 %v4743_v19, %v7380_v27  ;;  %v212_v41 = vsub.f32 %v4763_v25, %v7377_v32  ;;  %v4825_v47 = vand.u32 4294901760, %v4790_v34  ;;  %v7374_v48 = vand.u32 4294901760, %v4803_v38 }
   0xa   :  { %3751 = vmatprep.subr.mxu0 %v4729_v15  ;;  %v318_v40 = vand.u32 4294901760, %v317_v30  ;;  %v325_v46 = vand.u32 4294901760, %v324_v36  ;;  %v331_v51 = vsub.f32 %v4785_v33, %v7375_v43  ;;  %v4838_v52 = vand.u32 4294901760, %v4808_v39 }
   0xb   :  { %3752 = vmatpush3.msra.mxu0 %v4740_v18  ;;  %v206_v45 = vand.u32 4294901760, %v205_v35  ;;  %7671 = vst [vmem:[#allocation7_spill] sm:$0xff] %v4825_v47  ;;  %v213_v50 = vand.u32 4294901760, %v212_v41  ;;  %v4841_v53 = vsub.f32 %v49_v10, %v4729_v15  ;;  %v219_v55 = vsub.f32 %v4803_v38, %v7374_v48 }
   0xc   :  { %3753 = vmatprep.subr.mxu0 %v4754_v22  ;;  %3780 = vmatprep.subr.mxu1 %v318_v40  ;;  %7672 = vst [vmem:[#allocation8_spill] sm:$0xff] %v4838_v52  ;;  %v4853_v56 = vand.u32 4294901760, %v4821_v44  ;;  %v4856_v57 = vsub.f32 %v33_v12, %v4740_v18  ;;  %v332_v58 = vand.u32 4294901760, %v331_v51  ;;  %v4861_v60 = vand.u32 4294901760, %v4831_v49 }
   0xd   :  { %3754 = vmatpush3.msra.mxu0 %v4767_v26  ;;  %3781 = vmatpush3.msra.mxu1 %v206_v45  ;;  %v7373_v59 = vand.u32 4294901760, %v4841_v53  ;;  %v4864_v61 = vsub.f32 %v48_v14, %v4754_v22  ;;  %v220_v0 = vand.u32 4294901760, %v219_v55  ;;  %v4879_v2 = vand.u32 4294901760, %v4846_v54 }
   0xe   :  { %3755 = vmatprep.subr.mxu0 %v4781_v31  ;;  %7673 = vst [vmem:[#allocation9_spill] sm:$0xff] %v4853_v56  ;;  %3782 = vmatprep.subr.mxu1 %v325_v46  ;;  %7674 = vst [vmem:[#allocation10_spill] sm:$0xff] %v4861_v60  ;;  %v7371_v1 = vand.u32 4294901760, %v4856_v57  ;;  %v4888_v9 = vsub.f32 %v4737_v17, %v4767_v26  ;;  %v4895_v12 = vand.u32 4294901760, %v4869_v62  ;;  %v4902_v30 = vand.u32 4294901760, %v4874_v63  ;;  %v4907_v17 = vld [vmem:[%s7364_s1 + $0xa8] sm:$0xff] }
   0xf   :  { %3756 = vmatpush3.msra.mxu0 %v4800_v37  ;;  %3783 = vmatpush3.msra.mxu1 %v213_v50  ;;  %7675 = vst [vmem:[#allocation11_spill] sm:$0xff] %v4879_v2  ;;  %v338_v6 = vsub.f32 %v4841_v53, %v7373_v59  ;;  %v7369_v7 = vand.u32 4294901760, %v4864_v61  ;;  %v4899_v14 = vsub.f32 %v4748_v20, %v4781_v31  ;;  %v4917_v20 = vld [vmem:[%s7364_s1 + $0x28] sm:$0xff]  ;;  %v4930_v55 = vand.u32 4294901760, %v4907_v17 }
  0x10   :  { %3757 = vmatprep.subr.mxu0 %v4815_v42  ;;  %3784 = vmatprep.subr.mxu1 %v332_v58  ;;  %v226_v10 = vsub.f32 %v4856_v57, %v7371_v1  ;;  %7676 = vst [vmem:[#allocation12_spill] sm:$0xff] %v4895_v12  ;;  %7677 = vst [vmem:[#allocation13_spill] sm:$0xff] %v4902_v30  ;;  %v7368_v40 = vand.u32 4294901760, %v4888_v9  ;;  %v4923_v46 = vsub.f32 %v4760_v24, %v4800_v37  ;;  %v4939_v24 = vld [vmem:[%s7364_s1 + $0xa0] sm:$0xff] }
  0x11   :  { %3758 = vmatpush3.msra.mxu0 %v4825_v47  ;;  %3785 = vmatpush3.msra.mxu1 %v220_v0  ;;  %v339_v35 = vand.u32 4294901760, %v338_v6  ;;  %v345_v36 = vsub.f32 %v4864_v61, %v7369_v7  ;;  %v7367_v45 = vand.u32 4294901760, %v4899_v14  ;;  %7678 = vst [vmem:[#allocation14_spill] sm:$0xff] %v4930_v55  ;;  %v4934_v58 = vsub.f32 %v4774_v29, %v4815_v42  ;;  %v4952_v29 = vld [vmem:[%s7364_s1 + $0x20] sm:$0xff] }
  0x12   :  { %3759 = vmatprep.subr.mxu0 %v4838_v52  ;;  %v227_v41 = vand.u32 4294901760, %v226_v10  ;;  %v233_v51 = vsub.f32 %v4888_v9, %v7368_v40  ;;  %v7370_v6 = vand.u32 4294901760, %v4923_v46  ;;  %v4947_v10 = vand.u32 4294901760, %v4917_v20 }
  0x13   :  { %3760 = vmatpush3.msra.mxu0 %v4853_v56  ;;  %3786 = vmatprep.subr.mxu1 %v339_v35  ;;  %v346_v50 = vand.u32 4294901760, %v345_v36  ;;  %v352_v0 = vsub.f32 %v4899_v14, %v7367_v45  ;;  %v7372_v36 = vand.u32 4294901760, %v4934_v58  ;;  %v4965_v7 = vand.u32 4294901760, %v4939_v24 }
  0x14   :  { %3761 = vmatprep.subr.mxu0 %v4861_v60  ;;  %3787 = vmatpush3.msra.mxu1 %v227_v41  ;;  %7679 = vst [vmem:[#allocation15_spill] sm:$0xff] %v4947_v10  ;;  %v234_v35 = vand.u32 4294901760, %v233_v51  ;;  %v4958_v41 = vsub.f32 %v4790_v34, %v4825_v47  ;;  %v240_v40 = vsub.f32 %v4923_v46, %v7370_v6  ;;  %v4974_v51 = vld [vmem:[%s7364_s1 + $0x98] sm:$0xff]  ;;  %v4981_v6 = vand.u32 4294901760, %v4952_v29 }
  0x15   :  { %3762 = vmatpush3.msra.mxu0 %v4879_v2  ;;  %3788 = vmatprep.subr.mxu1 %v346_v50  ;;  %v353_v45 = vand.u32 4294901760, %v352_v0  ;;  %7680 = vst [vmem:[#allocation16_spill] sm:$0xff] %v4965_v7  ;;  %v4969_v50 = vsub.f32 %v4808_v39, %v4838_v52  ;;  %v359_v34 = vsub.f32 %v4934_v58, %v7372_v36  ;;  %v4986_v39 = vld [vmem:[%s7364_s1 + $0x18] sm:$0xff] }
  0x16   :  { %3763 = vmatprep.subr.mxu0 %v4895_v12  ;;  %3789 = vmatpush3.msra.mxu1 %v234_v35  ;;  %v7376_v0 = vand.u32 4294901760, %v4958_v41  ;;  %7681 = vst [vmem:[#allocation17_spill] sm:$0xff] %v4981_v6 }
  0x17   :  { %3764 = vmatpush3.msra.mxu0 %v4902_v30 }
  0x18   :  { %3765 = vmatprep.subr.mxu0 %v4930_v55 }
  0x19   :  { %3766 = vmatpush3.msra.mxu0 %v4947_v10 }
  0x1a   :  { %9 = vsyncpa [#allocation4], 0  ;;  %3790 = vmatprep.subr.mxu1 %v353_v45  ;;  %v241_v1 = vand.u32 4294901760, %v240_v40  ;;  %3767 = vmatprep.subr.mxu0 %v4965_v7  ;;  %v7379_v35 = vand.u32 4294901760, %v4969_v50  ;;  %v4992_v36 = vsub.f32 %v4821_v44, %v4853_v56  ;;  %v360_v59 = vand.u32 4294901760, %v359_v34  ;;  %v5008_v45 = vld [vmem:[%s7364_s1 + $0x90] sm:$0xff] }
  0x1b   :  { %v247_v48 = vsub.f32 %v4958_v41, %v7376_v0  ;;  %3768 = vmatpush3.msra.mxu0 %v4981_v6  ;;  %v4999_v43 = vand.u32 4294901760, %v4974_v51  ;;  %v5003_v40 = vsub.f32 %v4831_v49, %v4861_v60  ;;  %v5015_v0 = vand.u32 4294901760, %v4986_v39  ;;  %v5020_v49 = vld [vmem:[%s7364_s1 + $0x10] sm:$0xff]  ;;  %s4666_s8 = smov [#allocation3]  }
  0x1c   :  { %3791 = vmatpush3.msra.mxu1 %v241_v1  ;;  %v366_v44 = vsub.f32 %v4969_v50, %v7379_v35  ;;  %v7382_v34 = vand.u32 4294901760, %v4992_v36  ;;  %v5026_v28 = vsub.f32 %v4846_v54, %v4879_v2  ;;  %v5033_v23 = vand.u32 4294901760, %v5008_v45  ;;  %s3737_s9 = sshll.u32 %s4666_s8, 4  ;;  %s3738_s9 = int_to_ptr.vmem [resolvable:$true] %s3737_s9 }
  0x1d   :  { %7682 = vst [vmem:[#allocation18_spill] sm:$0xff] %v4999_v43  ;;  %7683 = vst [vmem:[#allocation19_spill] sm:$0xff] %v5015_v0  ;;  %3792 = vmatprep.subr.mxu1 %v360_v59  ;;  %v248_v32 = vand.u32 4294901760, %v247_v48  ;;  %3769 = vmatprep.subr.mxu0 %v4999_v43  ;;  %v7387_v1 = vand.u32 4294901760, %v5003_v40  ;;  %v5037_v48 = vsub.f32 %v4869_v62, %v4895_v12  ;;  %v5042_v59 = vld [vmem:[%s7364_s1 + $0x88] sm:$0xff]  ;;  %vm1817_vm0 = vcmask 130048   ;;  %p4649_p1 = scmp.lt.s32.totalorder %s3738_s9, %s3738_s9 }
  0x1e   :  { %v367_v35 = vand.u32 4294901760, %v366_v44  ;;  %v254_v27 = vsub.f32 %v4992_v36, %v7382_v34  ;;  %3770 = vmatpush3.msra.mxu0 %v5015_v0  ;;  %7684 = vst [vmem:[#allocation20_spill] sm:$0xff] %v5033_v23  ;;  %v7392_v44 = vand.u32 4294901760, %v5026_v28  ;;  %v5049_v34 = vand.u32 4294901760, %v5020_v49  ;;  %v5054_v62 = vld [vmem:[%s7364_s1 + $0x8] sm:$0xff]  ;;  %s4644_s14 = scalar_lea.vmem %s3738_s9, 512 }
  0x1f   :  { %3793 = vmatpush3.msra.mxu1 %v248_v32  ;;  %v373_v54 = vsub.f32 %v5003_v40, %v7387_v1  ;;  %3771 = vmatprep.subr.mxu0 %v5033_v23  ;;  %v7397_v32 = vand.u32 4294901760, %v5037_v48  ;;  %v5060_v2 = vsub.f32 %v4874_v63, %v4902_v30  ;;  %v5067_v56 = vand.u32 4294901760, %v5042_v59  ;;  %p4645_p0 = scmp.ne.s32.totalorder %s3738_s9, %s4644_s14  ;;  %p4650_p2 = scmp.lt.s32.totalorder %s4644_s14, %s4644_s14 }
  0x20   :  { %7685 = vst [vmem:[#allocation21_spill] sm:$0xff] %v5049_v34  ;;  %3794 = vmatprep.subr.mxu1 %v367_v35  ;;  %v255_v12 = vand.u32 4294901760, %v254_v27  ;;  %v261_v60 = vsub.f32 %v5026_v28, %v7392_v44  ;;  %3772 = vmatpush3.msra.mxu0 %v5049_v34  ;;  %v5071_v27 = vsub.f32 %v4907_v17, %v4930_v55  ;;  %v5076_v35 = vld [vmem:[%s7364_s1 + $0x80] sm:$0xff]  ;;  %v5083_v44 = vand.u32 4294901760, %v5054_v62 }
  0x21   :  { %7686 = vst [vmem:[#allocation22_spill] sm:$0xff] %v5060_v2  ;;  %v374_v1 = vand.u32 4294901760, %v373_v54  ;;  %v380_v63 = vsub.f32 %v5037_v48, %v7397_v32  ;;  %v7402_v54 = vand.u32 4294901760, %v5060_v2  ;;  %v5088_v17 = vld [vmem:[%s7364_s1] sm:$0xff]  ;;  %3773 = vmatprep.subr.mxu0 %v5067_v56  ;;  %v5094_v30 = vsub.f32 %v4917_v20, %v4947_v10  ;;  %p4651_p3 = por %p4650_p2, %p4649_p1 }
  0x22   :  { %7687 = vst [vmem:[#allocation23_spill] sm:$0xff] %v5071_v27  ;;  %3795 = vmatpush3.msra.mxu1 %v255_v12  ;;  %7688 = vst [vmem:[#allocation24_spill] sm:$0xff] %v5083_v44  ;;  %v262_v55 = vand.u32 4294901760, %v261_v60  ;;  %v7407_v12 = vand.u32 4294901760, %v5071_v27  ;;  %3774 = vmatpush3.msra.mxu0 %v5083_v44  ;;  %v5101_v47 = vand.u32 4294901760, %v5076_v35  ;;  %v5105_v60 = vsub.f32 %v4939_v24, %v4965_v7  ;;  %v16_v10 = vld [vmem:[%s7365_s2] sm:$0xff] }
  0x23   :  { %3796 = vmatprep.subr.mxu1 %v374_v1  ;;  %v381_v32 = vand.u32 4294901760, %v380_v63  ;;  %v268_v52 = vsub.f32 %v5060_v2, %v7402_v54  ;;  %v17_v1 = vld [vmem:[%s7365_s2 + $0x8] sm:$0xff]  ;;  %v7412_v63 = vand.u32 4294901760, %v5094_v30  ;;  %v5115_v54 = vand.u32 4294901760, %v5088_v17  ;;  %p4652_p4 = pnand %p4651_p3, %p4645_p0 }
  0x24   :  { %7689 = vst [vmem:[#allocation25_spill] sm:$0xff] %v5101_v47  ;;  %3797 = vmatpush3.msra.mxu1 %v262_v55  ;;  %v387_v20 = vsub.f32 %v5071_v27, %v7407_v12  ;;  %3775 = vmatprep.subr.mxu0 %v5101_v47  ;;  %v7415_v7 = vand.u32 4294901760, %v5105_v60  ;;  %v5124_v55 = vsub.f32 %v4952_v29, %v4981_v6 }
  0x25   :  { %3798 = vmatprep.subr.mxu1 %v381_v32  ;;  %v269_v24 = vand.u32 4294901760, %v268_v52  ;;  %v275_v27 = vsub.f32 %v5094_v30, %v7412_v63  ;;  %3776 = vmatpush3.msra.mxu0 %v5115_v54  ;;  %v86_v2 = vmul.f32 %v17_v1, %v17_v1  ;;  %v5132_v32 = vsub.f32 %v4974_v51, %v4999_v43 }
  0x26   :  { %v388_v12 = vand.u32 4294901760, %v387_v20  ;;  %v394_v52 = vsub.f32 %v5105_v60, %v7415_v7  ;;  %v7417_v29 = vand.u32 4294901760, %v5124_v55  ;;  %3815 = vmatprep.subr.mxu0 %v4732_v16  ;;  %v85_v20 = vmul.f32 %v16_v10, %v16_v10 }
  0x27   :  { %3799 = vmatpush3.msra.mxu1 %v269_v24  ;;  %v5141_v63 = vsub.f32 %v4986_v39, %v5015_v0  ;;  %v276_v1 = vand.u32 4294901760, %v275_v27  ;;  %v5143_v6 = vand.u32 4294901760, %v86_v2  ;;  %v7418_v51 = vand.u32 4294901760, %v5132_v32 }
  0x28   :  { %3800 = vmatprep.subr.mxu1 %v388_v12  ;;  %v5148_v24 = vsub.f32 %v5008_v45, %v5033_v23  ;;  %v395_v7 = vand.u32 4294901760, %v394_v52  ;;  %v282_v16 = vsub.f32 %v5124_v55, %v7417_v29  ;;  %v5153_v10 = vand.u32 4294901760, %v85_v20 }
  0x29   :  { %7690 = vst [vmem:[#allocation26_spill] sm:$0xff] %v5143_v6  ;;  %3801 = vmatpush3.msra.mxu1 %v276_v1  ;;  %v5157_v27 = vsub.f32 %v86_v2, %v5143_v6  ;;  %v401_v12 = vsub.f32 %v5132_v32, %v7418_v51  ;;  %v5165_v52 = vsub.f32 %v5020_v49, %v5049_v34  ;;  %v7692_v2 = vand.u32 4294901760, %v5141_v63 }
  0x2a   :  { %7691 = vst [vmem:[#allocation27_spill] sm:$0xff] %v5153_v10  ;;  %426 = vmatprep.mubr.f32.mxu1 %v5143_v6  ;;  %3802 = vmatprep.subr.mxu1 %v395_v7  ;;  %v283_v29 = vand.u32 4294901760, %v282_v16  ;;  %v5169_v39 = vsub.f32 %v85_v20, %v5153_v10  ;;  %v5176_v51 = vsub.f32 %v5042_v59, %v5067_v56  ;;  %v7693_v49 = vand.u32 4294901760, %v5148_v24 }
  0x2b   :  { %v289_v1 = vsub.f32 %v5141_v63, %v7692_v2  ;;  %v7426_v45 = vand.u32 4294901760, %v5157_v27  ;;  %v402_v23 = vand.u32 4294901760, %v401_v12  ;;  %v7425_v16 = vand.u32 4294901760, %v5165_v52 }
  0x2c   :  { %v408_v6 = vsub.f32 %v5148_v24, %v7693_v49  ;;  %3803 = vmatpush3.msra.mxu1 %v283_v29  ;;  %v7431_v7 = vand.u32 4294901760, %v5169_v39  ;;  %v7435_v34 = vand.u32 4294901760, %v5176_v51  ;;  %v5187_v2 = vsub.f32 %v5054_v62, %v5083_v44 }
  0x2d   :  { %v290_v20 = vand.u32 4294901760, %v289_v1  ;;  %v188_v59 = vsub.f32 %v5157_v27, %v7426_v45  ;;  %3804 = vmatprep.subr.mxu1 %v402_v23  ;;  %v296_v49 = vsub.f32 %v5165_v52, %v7425_v16  ;;  %v5197_v29 = vsub.f32 %v5076_v35, %v5101_v47 }
  0x2e   :  { %v409_v12 = vand.u32 4294901760, %v408_v6  ;;  %v194_v1 = vsub.f32 %v5169_v39, %v7431_v7  ;;  %v415_v62 = vsub.f32 %v5176_v51, %v7435_v34  ;;  %v7434_v23 = vand.u32 4294901760, %v5187_v2 }
  0x2f   :  { %7694 = vst [vmem:[#allocation28_spill] sm:$0xff] %v5197_v29  ;;  %3805 = vmatpush3.msra.mxu1 %v290_v20  ;;  %v5208_v6 = vsub.f32 %v5088_v17, %v5115_v54  ;;  %v189_v16 = vand.u32 4294901760, %v188_v59  ;;  %v297_v45 = vand.u32 4294901760, %v296_v49  ;;  %v7433_v35 = vand.u32 4294901760, %v5197_v29 }
  0x30   :  { %3806 = vmatprep.subr.mxu1 %v409_v12  ;;  %v195_v47 = vand.u32 4294901760, %v194_v1  ;;  %v416_v44 = vand.u32 4294901760, %v415_v62  ;;  %v303_v20 = vsub.f32 %v5187_v2, %v7434_v23  ;;  %v7698_v1 = vld [vmem:[#allocation8_spill] sm:$0xff]  ;;  %v7699_v62 = vld [vmem:[#allocation9_spill] sm:$0xff]  ;;  %v7708_v23 = vld [vmem:[#allocation6_spill] sm:$0xff] }
  0x31   :  { %v7432_v7 = vand.u32 4294901760, %v5208_v6  ;;  %190 = vmatprep.mubr.f32.mxu0 %v189_v16  ;;  %3807 = vmatpush3.msra.mxu1 %v297_v45  ;;  %v422_v17 = vsub.f32 %v5197_v29, %v7433_v35  ;;  %v7697_v16 = vld [vmem:[#allocation23_spill] sm:$0xff]  ;;  %v7707_v35 = vld [vmem:[#allocation17_spill] sm:$0xff]  ;;  %v7709_v34 = vand.u32 4294901760, %v7708_v23  ;;  %v7716_v23 = vld [vmem:[#allocation24_spill] sm:$0xff] }
  0x32   :  { %196 = vmatmul.mubr.f32.vlgmr.msra.gmra.mxu0 %v195_v47  ;;  %3808 = vmatprep.subr.mxu1 %v416_v44  ;;  %v304_v59 = vand.u32 4294901760, %v303_v20  ;;  %v7695_v47 = vld [vmem:[#allocation22_spill] sm:$0xff]  ;;  %v7696_v44 = vld [vmem:[#allocation7_spill] sm:$0xff] }
  0x33   :  { %v310_v12 = vsub.f32 %v5208_v6, %v7432_v7  ;;  %3816 = vmatpush3.msra.mxu0 %v4743_v19  ;;  %v423_v49 = vand.u32 4294901760, %v422_v17  ;;  %563 = vmatprep.mubr.f32.mxu0 %v5157_v27  ;;  %v7700_v20 = vld [vmem:[#allocation10_spill] sm:$0xff]  ;;  %v7701_v17 = vld [vmem:[#allocation11_spill] sm:$0xff]  ;;  %v7706_v7 = vld [vmem:[#allocation16_spill] sm:$0xff] }
  0x34   :  { %3817 = vmatprep.subr.mxu0 %v4751_v21  ;;  %3809 = vmatpush3.msra.mxu1 %v304_v59  ;;  %v7702_v59 = vld [vmem:[#allocation12_spill] sm:$0xff] }
  0x35   :  { %v311_v45 = vand.u32 4294901760, %v310_v12  ;;  %3818 = vmatpush3.msra.mxu0 %v4763_v25  ;;  %3810 = vmatprep.subr.mxu1 %v423_v49  ;;  %v7703_v12 = vld [vmem:[#allocation13_spill] sm:$0xff]  ;;  %v7704_v49 = vld [vmem:[#allocation14_spill] sm:$0xff] }
  0x36   :  { %3819 = vmatprep.subr.mxu0 %v4785_v33 }
  0x37   :  { %3811 = vmatpush3.msra.mxu1 %v311_v45  ;;  %3820 = vmatpush3.msra.mxu0 %v4803_v38  ;;  %v7705_v45 = vld [vmem:[#allocation15_spill] sm:$0xff] }
  0x38   :  { %428 = vmatmul.mubr.f32.vlgmr.msra.gmra.mxu1 %v5153_v10  ;;  %3821 = vmatprep.subr.mxu0 %v4841_v53  ;;  %v7710_v10 = vand.u32 4294901760, %v4743_v19  ;;  %v7717_v19 = vand.u32 4294901760, %v4803_v38  ;;  %v7724_v38 = vand.u32 4294901760, %v4888_v9 }
  0x39   :  { %3850 = vmatprep.subr.mxu1 %v4696_v3  ;;  %3822 = vmatpush3.msra.mxu0 %v4856_v57 }
  0x3a   :  { %3851 = vmatpush3.msra.mxu1 %v4698_v4  ;;  %3823 = vmatprep.subr.mxu0 %v4864_v61 }
  0x3b   :  { %3852 = vmatprep.subr.mxu1 %v4700_v5  ;;  %3824 = vmatpush3.msra.mxu0 %v4888_v9  ;;  %v7730_v9 = vand.u32 4294901760, %v4992_v36 }
  0x3c   :  { %3853 = vmatpush3.msra.mxu1 %v4708_v8  ;;  %3825 = vmatprep.subr.mxu0 %v4899_v14 }
  0x3d   :  { %3854 = vmatprep.subr.mxu1 %v4717_v11  ;;  %3826 = vmatpush3.msra.mxu0 %v4923_v46 }
  0x3e   :  { %3855 = vmatpush3.msra.mxu1 %v4723_v13  ;;  %3827 = vmatprep.subr.mxu0 %v4934_v58 }
  0x3f   :  { %3856 = vmatprep.subr.mxu1 %v4729_v15  ;;  %3828 = vmatpush3.msra.mxu0 %v4958_v41 }
  0x40   :  { %3857 = vmatpush3.msra.mxu1 %v4740_v18  ;;  %3829 = vmatprep.subr.mxu0 %v4969_v50 }
  0x41   :  { %3858 = vmatprep.subr.mxu1 %v4754_v22  ;;  %3830 = vmatpush3.msra.mxu0 %v4992_v36 }
  0x42   :  { %3859 = vmatpush3.msra.mxu1 %v4767_v26  ;;  %3831 = vmatprep.subr.mxu0 %v5003_v40 }
  0x43   :  { %3860 = vmatprep.subr.mxu1 %v4781_v31  ;;  %3832 = vmatpush3.msra.mxu0 %v5026_v28 }
  0x44   :  { %3861 = vmatpush3.msra.mxu1 %v4800_v37  ;;  %3833 = vmatprep.subr.mxu0 %v5037_v48 }
  0x45   :  { %3862 = vmatprep.subr.mxu1 %v4815_v42  ;;  %3834 = vmatpush3.msra.mxu0 %v7695_v47 }
  0x46   :  { %3863 = vmatpush3.msra.mxu1 %v7696_v44  ;;  %3835 = vmatprep.subr.mxu0 %v7697_v16 }
  0x47   :  { %3864 = vmatprep.subr.mxu1 %v7698_v1  ;;  %3836 = vmatpush3.msra.mxu0 %v5094_v30 }
  0x48   :  { %3865 = vmatpush3.msra.mxu1 %v7699_v62  ;;  %3837 = vmatprep.subr.mxu0 %v5105_v60 }
  0x49   :  { %3866 = vmatprep.subr.mxu1 %v7700_v20  ;;  %3838 = vmatpush3.msra.mxu0 %v5124_v55 }
  0x4a   :  { %3867 = vmatpush3.msra.mxu1 %v7701_v17  ;;  %3839 = vmatprep.subr.mxu0 %v5132_v32 }
  0x4b   :  { %3868 = vmatprep.subr.mxu1 %v7702_v59  ;;  %3840 = vmatpush3.msra.mxu0 %v5141_v63 }
  0x4c   :  { %3869 = vmatpush3.msra.mxu1 %v7703_v12  ;;  %3841 = vmatprep.subr.mxu0 %v5148_v24 }
  0x4d   :  { %3870 = vmatprep.subr.mxu1 %v7704_v49  ;;  %3842 = vmatpush3.msra.mxu0 %v5165_v52 }
  0x4e   :  { %3871 = vmatpush3.msra.mxu1 %v7705_v45  ;;  %3843 = vmatprep.subr.mxu0 %v5176_v51 }
  0x4f   :  { %3872 = vmatprep.subr.mxu1 %v7706_v7  ;;  %3844 = vmatpush3.msra.mxu0 %v5187_v2  ;;  %v7711_v7 = vld [vmem:[#allocation20_spill] sm:$0xff] }
  0x50   :  { %3873 = vmatpush3.msra.mxu1 %v7707_v35  ;;  %3845 = vmatprep.subr.mxu0 %v5197_v29  ;;  %v7712_v35 = vand.u32 4294901760, %v4751_v21  ;;  %v7713_v29 = vld [vmem:[#allocation21_spill] sm:$0xff]  ;;  %v7719_v21 = vand.u32 4294901760, %v4841_v53  ;;  %v7725_v53 = vand.u32 4294901760, %v4899_v14  ;;  %v67_v14 = vld [vmem:[%s7364_s1 + $0x170] sm:$0xff] }
  0x51   :  { %3874 = vmatprep.subr.mxu1 %v4999_v43  ;;  %3846 = vmatpush3.msra.mxu0 %v5208_v6  ;;  %v7714_v43 = vand.u32 4294901760, %v4763_v25  ;;  %v7720_v25 = vand.u32 4294901760, %v5157_v27 }
  0x52   :  { %3875 = vmatpush3.msra.mxu1 %v5015_v0  ;;  %566 = vmatmul.mubr.f32.vlgmr.msra.gmra.mxu0 %v5169_v39  ;;  %v7715_v0 = vand.u32 4294901760, %v4785_v33  ;;  %v7722_v33 = vand.u32 4294901760, %v5169_v39 }
  0x53   :  { %3885 = vmatprep.subr.mxu0 %v7709_v34  ;;  %3876 = vmatprep.subr.mxu1 %v7711_v7  ;;  %v7718_v34 = vld [vmem:[#allocation25_spill] sm:$0xff] }
  0x54   :  { %3886 = vmatpush3.msra.mxu0 %v7710_v10  ;;  %3877 = vmatpush3.msra.mxu1 %v7713_v29  ;;  %v65_v10 = vld [vmem:[%s7364_s1 + $0x160] sm:$0xff] }
  0x55   :  { %3887 = vmatprep.subr.mxu0 %v7712_v35  ;;  %3878 = vmatprep.subr.mxu1 %v5067_v56  ;;  %v7739_v35 = vand.u32 4294901760, %v5105_v60 }
  0x56   :  { %3888 = vmatpush3.msra.mxu0 %v7714_v43  ;;  %3879 = vmatpush3.msra.mxu1 %v7716_v23  ;;  %v7721_v43 = vand.u32 4294901760, %v4856_v57  ;;  %v7726_v57 = vand.u32 4294901760, %v4923_v46 }
  0x57   :  { %3889 = vmatprep.subr.mxu0 %v7715_v0  ;;  %3880 = vmatprep.subr.mxu1 %v7718_v34  ;;  %v7723_v0 = vand.u32 4294901760, %v4864_v61  ;;  %v7727_v61 = vand.u32 4294901760, %v4934_v58 }
  0x58   :  { %3890 = vmatpush3.msra.mxu0 %v7717_v19  ;;  %3881 = vmatpush3.msra.mxu1 %v5115_v54  ;;  %v5410_v19 = vand.u32 4294901760, %v65_v10 }
  0x59   :  { %3891 = vmatprep.subr.mxu0 %v7719_v21  ;;  %670 = vmatprep.mubr.f32.mxu1 %v7720_v25  ;;  %v7744_v21 = vand.u32 4294901760, %v5132_v32 }
  0x5a   :  { %3892 = vmatpush3.msra.mxu0 %v7721_v43  ;;  %674 = vmatmul.mubr.f32.vlgmr.msra.gmra.mxu1 %v7722_v33  ;;  %7743 = vst [vmem:[#allocation9_spill] sm:$0xff] %v5410_v19  ;;  %v7745_v33 = vand.u32 4294901760, %v5141_v63 }
  0x5b   :  { %3893 = vmatprep.subr.mxu0 %v7723_v0  ;;  %3920 = vmatprep.subr.mxu1 %v4696_v3  ;;  %v7728_v3 = vand.u32 4294901760, %v4958_v41  ;;  %v82_v41 = vld [vmem:[%s7364_s1 + $0x1e8] sm:$0xff]  ;;  %v79_v0 = vld [vmem:[%s7364_s1 + $0x1d0] sm:$0xff] }
  0x5c   :  { %3894 = vmatpush3.msra.mxu0 %v7724_v38  ;;  %3921 = vmatpush3.msra.mxu1 %v4698_v4  ;;  %v84_v4 = vld [vmem:[%s7364_s1 + $0x1f8] sm:$0xff] }
  0x5d   :  { %3895 = vmatprep.subr.mxu0 %v7725_v53  ;;  %3922 = vmatprep.subr.mxu1 %v4700_v5  ;;  %v68_v5 = vld [vmem:[%s7364_s1 + $0x178] sm:$0xff]  ;;  %v5345_v46 = vand.u32 4294901760, %v84_v4  ;;  %v7748_v53 = vand.u32 4294901760, %v5148_v24  ;;  %v62_v24 = vld [vmem:[%s7364_s1 + $0x148] sm:$0xff] }
  0x5e   :  { %3896 = vmatpush3.msra.mxu0 %v7726_v57  ;;  %3923 = vmatpush3.msra.mxu1 %v4708_v8  ;;  %v7729_v8 = vand.u32 4294901760, %v4969_v50  ;;  %v5347_v58 = vand.u32 4294901760, %v68_v5  ;;  %v5360_v50 = vand.u32 4294901760, %v67_v14  ;;  %v7749_v57 = vand.u32 4294901760, %v5165_v52 }
  0x5f   :  { %3897 = vmatprep.subr.mxu0 %v7727_v61  ;;  %3924 = vmatprep.subr.mxu1 %v4717_v11  ;;  %v83_v11 = vld [vmem:[%s7364_s1 + $0x1f0] sm:$0xff]  ;;  %v5383_v39 = vsub.f32 %v84_v4, %v5345_v46  ;;  %v5445_v61 = vsub.f32 %v65_v10, %v5410_v19  ;;  %v7751_v4 = vand.u32 4294901760, %v5176_v51  ;;  %v7753_v51 = vand.u32 4294901760, %v5187_v2 }
  0x60   :  { %3898 = vmatpush3.msra.mxu0 %v7728_v3  ;;  %3925 = vmatpush3.msra.mxu1 %v4723_v13  ;;  %v7731_v13 = vand.u32 4294901760, %v5003_v40  ;;  %v5352_v36 = vand.u32 4294901760, %v83_v11  ;;  %7734 = vst [vmem:[#allocation22_spill] sm:$0xff] %v5360_v50  ;;  %v7736_v40 = vand.u32 4294901760, %v7697_v16 }
  0x61   :  { %3899 = vmatprep.subr.mxu0 %v7729_v8  ;;  %3926 = vmatprep.subr.mxu1 %v4729_v15  ;;  %v7732_v15 = vand.u32 4294901760, %v5026_v28  ;;  %v66_v28 = vld [vmem:[%s7364_s1 + $0x168] sm:$0xff]  ;;  %v7448_v25 = vand.u32 4294901760, %v5383_v39 }
  0x62   :  { %3900 = vmatpush3.msra.mxu0 %v7730_v9  ;;  %3927 = vmatpush3.msra.mxu1 %v4740_v18  ;;  %v7733_v18 = vand.u32 4294901760, %v5037_v48  ;;  %v5374_v48 = vand.u32 4294901760, %v82_v41  ;;  %v5389_v27 = vsub.f32 %v83_v11, %v5352_v36  ;;  %v5397_v16 = vand.u32 4294901760, %v66_v28  ;;  %v78_v8 = vld [vmem:[%s7364_s1 + $0x1c8] sm:$0xff] }
  0x63   :  { %3901 = vmatprep.subr.mxu0 %v7731_v13  ;;  %3928 = vmatprep.subr.mxu1 %v4754_v22  ;;  %v7735_v22 = vand.u32 4294901760, %v7695_v47  ;;  %v5395_v47 = vsub.f32 %v67_v14, %v5360_v50  ;;  %v5461_v52 = vsub.f32 %v5383_v39, %v7448_v25  ;;  %v7754_v13 = vld [vmem:[#allocation28_spill] sm:$0xff] }
  0x64   :  { %3902 = vmatpush3.msra.mxu0 %v7732_v15  ;;  %3929 = vmatpush3.msra.mxu1 %v4767_v26  ;;  %v5372_v26 = vsub.f32 %v68_v5, %v5347_v58  ;;  %7737 = vst [vmem:[#allocation7_spill] sm:$0xff] %v5374_v48  ;;  %7740 = vst [vmem:[#allocation23_spill] sm:$0xff] %v5397_v16  ;;  %v7444_v38 = vand.u32 4294901760, %v5389_v27  ;;  %v5468_v5 = vand.u32 4294901760, %v79_v0  ;;  %v7755_v15 = vand.u32 4294901760, %v7754_v13 }
  0x65   :  { %3903 = vmatprep.subr.mxu0 %v7733_v18  ;;  %3930 = vmatprep.subr.mxu1 %v4781_v31  ;;  %v81_v31 = vld [vmem:[%s7364_s1 + $0x1e0] sm:$0xff]  ;;  %v7443_v63 = vand.u32 4294901760, %v5395_v47 }
  0x66   :  { %3904 = vmatpush3.msra.mxu0 %v7735_v22  ;;  %3931 = vmatpush3.msra.mxu1 %v4800_v37  ;;  %v7738_v37 = vand.u32 4294901760, %v5094_v30  ;;  %v64_v30 = vld [vmem:[%s7364_s1 + $0x158] sm:$0xff]  ;;  %v5408_v60 = vand.u32 4294901760, %v81_v31  ;;  %v7447_v43 = vand.u32 4294901760, %v5372_v26  ;;  %7752 = vst [vmem:[#allocation13_spill] sm:$0xff] %v5468_v5  ;;  %v5483_v9 = vsub.f32 %v5389_v27, %v7444_v38  ;;  %v61_v18 = vld [vmem:[%s7364_s1 + $0x140] sm:$0xff] }
  0x67   :  { %3905 = vmatprep.subr.mxu0 %v7736_v40  ;;  %3932 = vmatprep.subr.mxu1 %v4815_v42  ;;  %v80_v42 = vld [vmem:[%s7364_s1 + $0x1d8] sm:$0xff]  ;;  %v5428_v32 = vand.u32 4294901760, %v64_v30  ;;  %v5494_v2 = vsub.f32 %v5395_v47, %v7443_v63  ;;  %v7757_v22 = vld [vmem:[#allocation16_spill] sm:$0xff]  ;;  %v5508_v40 = vand.u32 4294901760, %v78_v8 }
  0x68   :  { %3906 = vmatpush3.msra.mxu0 %v7738_v37  ;;  %3933 = vmatpush3.msra.mxu1 %v7696_v44  ;;  %v7741_v44 = vand.u32 4294901760, %v5124_v55  ;;  %7742 = vst [vmem:[#allocation8_spill] sm:$0xff] %v5408_v60  ;;  %v5421_v55 = vsub.f32 %v82_v41, %v5374_v48  ;;  %v7446_v37 = vand.u32 4294901760, %v5445_v61  ;;  %v5578_v38 = vld [vmem:[%s7364_s1 + $0x1b0] sm:$0xff] }
  0x69   :  { %3907 = vmatprep.subr.mxu0 %v7739_v35  ;;  %3934 = vmatprep.subr.mxu1 %v7698_v1  ;;  %v63_v1 = vld [vmem:[%s7364_s1 + $0x150] sm:$0xff]  ;;  %7747 = vst [vmem:[#allocation11_spill] sm:$0xff] %v5428_v32  ;;  %v5478_v11 = vsub.f32 %v64_v30, %v5428_v32  ;;  %7759 = vst [vmem:[#allocation15_spill] sm:$0xff] %v5508_v40  ;;  %v7760_v35 = vld [vmem:[#allocation26_spill] sm:$0xff]  ;;  %v5591_v25 = vsub.f32 %v78_v8, %v5508_v40 }
  0x6a   :  { %3908 = vmatpush3.msra.mxu0 %v7741_v44  ;;  %3935 = vmatpush3.msra.mxu1 %v7699_v62  ;;  %v5426_v62 = vand.u32 4294901760, %v80_v42  ;;  %v5447_v3 = vand.u32 4294901760, %v63_v1  ;;  %v58_v8 = vld [vmem:[%s7364_s1 + $0x128] sm:$0xff]  ;;  %v73_v30 = vld [vmem:[%s7364_s1 + $0x1a0] sm:$0xff] }
  0x6b   :  { %3909 = vmatprep.subr.mxu0 %v7744_v21  ;;  %3936 = vmatprep.subr.mxu1 %v7700_v20  ;;  %v5438_v20 = vsub.f32 %v66_v28, %v5397_v16  ;;  %v5527_v21 = vld [vmem:[%s7364_s1 + $0x1b8] sm:$0xff] }
  0x6c   :  { %3910 = vmatpush3.msra.mxu0 %v7745_v33  ;;  %7746 = vst [vmem:[#allocation10_spill] sm:$0xff] %v5426_v62  ;;  %3937 = vmatpush3.msra.mxu1 %v7701_v17  ;;  %7750 = vst [vmem:[#allocation12_spill] sm:$0xff] %v5447_v3  ;;  %v5453_v17 = vsub.f32 %v81_v31, %v5408_v60  ;;  %v5486_v14 = vsub.f32 %v80_v42, %v5426_v62  ;;  %v77_v31 = vld [vmem:[%s7364_s1 + $0x1c0] sm:$0xff]  ;;  %v7761_v42 = vld [vmem:[#allocation17_spill] sm:$0xff] }
  0x6d   :  { %3911 = vmatprep.subr.mxu0 %v7748_v53  ;;  %3938 = vmatprep.subr.mxu1 %v7702_v59  ;;  %v5466_v59 = vsub.f32 %v5372_v26, %v7447_v43  ;;  %v7442_v41 = vand.u32 4294901760, %v5438_v20  ;;  %v5506_v28 = vsub.f32 %v63_v1, %v5447_v3  ;;  %v60_v1 = vld [vmem:[%s7364_s1 + $0x138] sm:$0xff]  ;;  %v5533_v33 = vsub.f32 %v79_v0, %v5468_v5  ;;  %v7762_v53 = vld [vmem:[#allocation27_spill] sm:$0xff] }
  0x6e   :  { %3912 = vmatpush3.msra.mxu0 %v7749_v57  ;;  %3939 = vmatpush3.msra.mxu1 %v7703_v12  ;;  %v7441_v12 = vand.u32 4294901760, %v5421_v55  ;;  %v7445_v10 = vand.u32 4294901760, %v5453_v17  ;;  %v7763_v57 = vld [vmem:[#allocation18_spill] sm:$0xff]  ;;  %v7449_v13 = vand.u32 4294901760, %v5486_v14  ;;  %v5573_v63 = vand.u32 4294901760, %v60_v1  ;;  %v5588_v43 = vld [vmem:[%s7364_s1 + $0x1a8] sm:$0xff] }
  0x6f   :  { %3913 = vmatprep.subr.mxu0 %v7751_v4  ;;  %3940 = vmatprep.subr.mxu1 %v7704_v49  ;;  %v5496_v49 = vand.u32 4294901760, %v62_v24 }
  0x70   :  { %3914 = vmatpush3.msra.mxu0 %v7753_v51  ;;  %3941 = vmatpush3.msra.mxu1 %v7705_v45  ;;  %v7758_v45 = vand.u32 4294901760, %v5208_v6  ;;  %v5522_v44 = vsub.f32 %v5421_v55, %v7441_v12  ;;  %v5538_v51 = vand.u32 4294901760, %v61_v18  ;;  %v59_v12 = vld [vmem:[%s7364_s1 + $0x130] sm:$0xff]  ;;  %7769 = vst [vmem:[#allocation25_spill] sm:$0xff] %v5573_v63  ;;  %v5649_v6 = vand.u32 4294901760, %v58_v8 }
  0x71   :  { %3915 = vmatprep.subr.mxu0 %v7755_v15  ;;  %7756 = vst [vmem:[#allocation14_spill] sm:$0xff] %v5496_v49  ;;  %3942 = vmatprep.subr.mxu1 %v7757_v22  ;;  %v7450_v15 = vand.u32 4294901760, %v5478_v11  ;;  %v7765_v22 = vld [vmem:[#allocation19_spill] sm:$0xff]  ;;  %v5546_v0 = vsub.f32 %v62_v24, %v5496_v49  ;;  %v5563_v24 = vsub.f32 %v5453_v17, %v7445_v10  ;;  %v7451_v10 = vand.u32 4294901760, %v5533_v33 }
  0x72   :  { %3916 = vmatpush3.msra.mxu0 %v7758_v45  ;;  %840 = vmatprep.mubr.f32.mxu0 %v7760_v35  ;;  %7764 = vst [vmem:[#allocation6_spill] sm:$0xff] %v5538_v51  ;;  %v5608_v4 = vand.u32 4294901760, %v59_v12  ;;  %7775 = vst [vmem:[#allocation18_spill] sm:$0xff] %v5649_v6 }
  0x73   :  { %3943 = vmatpush3.msra.mxu1 %v7761_v42  ;;  %842 = vmatmul.mubr.f32.vlgmr.msra.gmra.mxu0 %v7762_v53  ;;  %7766 = vst [vmem:[#allocation20_spill] sm:$0xff] %v5546_v0  ;;  %v5551_v42 = vsub.f32 %v5438_v20, %v7442_v41  ;;  %v5571_v41 = vand.u32 4294901760, %v5527_v21  ;;  %v5606_v45 = vsub.f32 %v5478_v11, %v7450_v15 }
  0x74   :  { %3944 = vmatprep.subr.mxu1 %v7763_v57  ;;  %3955 = vmatprep.subr.mxu0 %v5345_v46  ;;  %v5553_v57 = vand.u32 4294901760, %v77_v31  ;;  %7771 = vst [vmem:[#allocation16_spill] sm:$0xff] %v5608_v4 }
  0x75   :  { %3945 = vmatpush3.msra.mxu1 %v7765_v22  ;;  %3956 = vmatpush3.msra.mxu0 %v5347_v58  ;;  %v5568_v22 = vsub.f32 %v5445_v61, %v7446_v37  ;;  %7768 = vst [vmem:[#allocation24_spill] sm:$0xff] %v5571_v41  ;;  %v7452_v37 = vand.u32 4294901760, %v5506_v28 }
  0x76   :  { %7767 = vst [vmem:[#allocation21_spill] sm:$0xff] %v5553_v57  ;;  %3946 = vmatprep.subr.mxu1 %v7711_v7  ;;  %3957 = vmatprep.subr.mxu0 %v5352_v36  ;;  %v5601_v7 = vsub.f32 %v5486_v14, %v7449_v13  ;;  %v5621_v15 = vsub.f32 %v77_v31, %v5553_v57  ;;  %v19_v13 = vld [vmem:[%s7365_s2 + $0x18] sm:$0xff] }
  0x77   :  { %3947 = vmatpush3.msra.mxu1 %v7713_v29  ;;  %3958 = vmatpush3.msra.mxu0 %v5360_v50  ;;  %v5596_v29 = vsub.f32 %v61_v18, %v5538_v51  ;;  %v5617_v18 = vand.u32 4294901760, %v5578_v38  ;;  %v5646_v31 = vsub.f32 %v5506_v28, %v7452_v37  ;;  %v88_v37 = vmul.f32 %v19_v13, %v19_v13 }
  0x78   :  { %3948 = vmatprep.subr.mxu1 %v5067_v56  ;;  %3959 = vmatprep.subr.mxu0 %v5374_v48  ;;  %v5631_v56 = vand.u32 4294901760, %v5588_v43  ;;  %v7776_v48 = vand.u32 4294901760, %v5546_v0  ;;  %v7786_v13 = vand.u32 4294901760, %v5621_v15 }
  0x79   :  { %7770 = vst [vmem:[#allocation28_spill] sm:$0xff] %v5596_v29  ;;  %3949 = vmatpush3.msra.mxu1 %v7716_v23  ;;  %7772 = vst [vmem:[#allocation26_spill] sm:$0xff] %v5617_v18  ;;  %3960 = vmatpush3.msra.mxu0 %v5397_v16  ;;  %v5628_v23 = vsub.f32 %v60_v1, %v5573_v63  ;;  %v5679_v1 = vld [vmem:[%s7364_s1 + $0x198] sm:$0xff]  ;;  %v7777_v16 = vand.u32 4294901760, %v5461_v52 }
  0x7a   :  { %3950 = vmatprep.subr.mxu1 %v7718_v34  ;;  %7774 = vst [vmem:[#allocation27_spill] sm:$0xff] %v5631_v56  ;;  %3961 = vmatprep.subr.mxu0 %v5408_v60  ;;  %v5641_v34 = vsub.f32 %v5533_v33, %v7451_v10  ;;  %v18_v10 = vld [vmem:[%s7365_s2 + $0x10] sm:$0xff]  ;;  %v5665_v60 = vsub.f32 %v59_v12, %v5608_v4 }
  0x7b   :  { %7773 = vst [vmem:[#allocation17_spill] sm:$0xff] %v5628_v23  ;;  %3951 = vmatpush3.msra.mxu1 %v5115_v54  ;;  %v57_v54 = vld [vmem:[%s7364_s1 + $0x120] sm:$0xff]  ;;  %944 = vmatprep.mubr.f32.mxu1 %v7760_v35  ;;  %v5673_v50 = vsub.f32 %v5546_v0, %v7776_v48  ;;  %v5683_v12 = vsub.f32 %v5527_v21, %v5571_v41  ;;  %v5691_v48 = vand.u32 4294901760, %v73_v30  ;;  %v7779_v21 = vand.u32 4294901760, %v5466_v59 }
  0x7c   :  { %3962 = vmatpush3.msra.mxu0 %v5410_v19  ;;  %946 = vmatmul.mubr.f32.vlgmr.msra.gmra.mxu1 %v7762_v53  ;;  %v56_v53 = vld [vmem:[%s7364_s1 + $0x118] sm:$0xff]  ;;  %v5693_v35 = vand.u32 4294901760, %v57_v54  ;;  %v87_v19 = vmul.f32 %v18_v10, %v18_v10  ;;  %v1215_v0 = vand.u32 4294901760, %v5641_v34  ;;  %v7782_v59 = vand.u32 4294901760, %v5596_v29 }
  0x7d   :  { %3963 = vmatprep.subr.mxu0 %v5426_v62  ;;  %3990 = vmatprep.subr.mxu1 %v7777_v16  ;;  %v7780_v16 = vand.u32 4294901760, %v5591_v25  ;;  %v7781_v62 = vand.u32 4294901760, %v5483_v9  ;;  %v5718_v34 = vand.u32 4294901760, %v5679_v1  ;;  %v5727_v9 = vsub.f32 %v5578_v38, %v5617_v18 }
  0x7e   :  { %3964 = vmatpush3.msra.mxu0 %v5428_v32  ;;  %7778 = vst [vmem:[#allocation19_spill] sm:$0xff] %v5693_v35  ;;  %3991 = vmatpush3.msra.mxu1 %v7779_v21  ;;  %v5707_v32 = vsub.f32 %v58_v8, %v5649_v6  ;;  %v5715_v10 = vsub.f32 %v5596_v29, %v7782_v59  ;;  %v5720_v21 = vand.u32 4294901760, %v56_v53  ;;  %v71_v8 = vld [vmem:[%s7364_s1 + $0x190] sm:$0xff]  ;;  %v1110_v59 = vand.u32 4294901760, %v5673_v50 }
  0x7f   :  { %3965 = vmatprep.subr.mxu0 %v5468_v5  ;;  %v5704_v52 = vsub.f32 %v5591_v25, %v7780_v16  ;;  %3992 = vmatprep.subr.mxu1 %v7781_v62  ;;  %7783 = vst [vmem:[#allocation29_spill] sm:$0xff] %v5718_v34  ;;  %v55_v62 = vld [vmem:[%s7364_s1 + $0x110] sm:$0xff]  ;;  %v7785_v16 = vand.u32 4294901760, %v5494_v2  ;;  %v5742_v38 = vand.u32 4294901760, %v88_v37  ;;  %v7788_v29 = vand.u32 4294901760, %v5522_v44 }
  0x80   :  { %3966 = vmatpush3.msra.mxu0 %v5447_v3  ;;  %7784 = vst [vmem:[#allocation30_spill] sm:$0xff] %v5720_v21  ;;  %v5739_v3 = vsub.f32 %v5621_v15, %v7786_v13  ;;  %v5748_v2 = vsub.f32 %v57_v54, %v5693_v35  ;;  %v70_v13 = vld [vmem:[%s7364_s1 + $0x188] sm:$0xff]  ;;  %v5760_v5 = vsub.f32 %v5588_v43, %v5631_v56  ;;  %v5762_v44 = vand.u32 4294901760, %v87_v19 }
  0x81   :  { %3993 = vmatpush3.msra.mxu1 %v7785_v16  ;;  %3967 = vmatprep.subr.mxu0 %v5508_v40  ;;  %7787 = vst [vmem:[#allocation31_spill] sm:$0xff] %v5742_v38  ;;  %v7789_v16 = vand.u32 4294901760, %v5628_v23  ;;  %v1222_v54 = vand.u32 4294901760, %v5704_v52  ;;  %v1117_v43 = vand.u32 4294901760, %v5715_v10  ;;  %v54_v52 = vld [vmem:[%s7364_s1 + $0x108] sm:$0xff]  ;;  %v7794_v40 = vand.u32 4294901760, %v5568_v22 }
  0x82   :  { %3994 = vmatprep.subr.mxu1 %v7788_v29  ;;  %3968 = vmatpush3.msra.mxu0 %v5496_v49  ;;  %7790 = vst [vmem:[#allocation32_spill] sm:$0xff] %v5762_v44  ;;  %v7791_v29 = vand.u32 4294901760, %v5551_v42  ;;  %v5768_v49 = vand.u32 4294901760, %v71_v8  ;;  %v5778_v42 = vsub.f32 %v56_v53, %v5720_v21  ;;  %v5794_v10 = vand.u32 4294901760, %v70_v13 }
  0x83   :  { %v5753_v50 = vsub.f32 %v5628_v23, %v7789_v16  ;;  %3969 = vmatprep.subr.mxu0 %v5553_v57  ;;  %v5770_v16 = vand.u32 4294901760, %v55_v62  ;;  %v7793_v23 = vand.u32 4294901760, %v5563_v24  ;;  %v5785_v57 = vsub.f32 %v73_v30, %v5691_v48  ;;  %1288 = vmatprep.mubr.f32.mxu1 %v5742_v38 }
  0x84   :  { %3995 = vmatpush3.msra.mxu1 %v7791_v29  ;;  %7792 = vst [vmem:[#allocation33_spill] sm:$0xff] %v5768_v49  ;;  %3970 = vmatpush3.msra.mxu0 %v5538_v51  ;;  %v1229_v24 = vand.u32 4294901760, %v5739_v3  ;;  %v69_v29 = vld [vmem:[%s7364_s1 + $0x180] sm:$0xff]  ;;  %v5800_v30 = vsub.f32 %v88_v37, %v5742_v38  ;;  %v7796_v22 = vand.u32 4294901760, %v5601_v7  ;;  %v5815_v37 = vsub.f32 %v5679_v1, %v5718_v34 }
  0x85   :  { %3996 = vmatprep.subr.mxu1 %v7793_v23  ;;  %3971 = vmatprep.subr.mxu0 %v5571_v41  ;;  %v7795_v23 = vand.u32 4294901760, %v5683_v12  ;;  %v1124_v3 = vand.u32 4294901760, %v5753_v50  ;;  %v5811_v41 = vsub.f32 %v87_v19, %v5762_v44  ;;  %v7797_v7 = vand.u32 4294901760, %v5606_v45 }
  0x86   :  { %3997 = vmatpush3.msra.mxu1 %v7794_v40  ;;  %3972 = vmatpush3.msra.mxu0 %v5573_v63  ;;  %v5821_v50 = vsub.f32 %v55_v62, %v5770_v16  ;;  %v5826_v63 = vand.u32 4294901760, %v54_v52  ;;  %v7799_v1 = vand.u32 4294901760, %v5727_v9  ;;  %v7837_v38 = vld [vmem:[#allocation29_spill] sm:$0xff] }
  0x87   :  { %v1235_v53 = vsub.f32 %v5683_v12, %v7795_v23  ;;  %3998 = vmatprep.subr.mxu1 %v7796_v22  ;;  %v53_v23 = vld [vmem:[%s7364_s1 + $0x100] sm:$0xff]  ;;  %3973 = vmatprep.subr.mxu0 %v5617_v18  ;;  %v7798_v22 = vand.u32 4294901760, %v5665_v60  ;;  %v5837_v18 = vsub.f32 %v71_v8, %v5768_v49 }
  0x88   :  { %3999 = vmatpush3.msra.mxu1 %v7797_v7  ;;  %3974 = vmatpush3.msra.mxu0 %v5608_v4  ;;  %v1242_v45 = vsub.f32 %v5727_v9, %v7799_v1  ;;  %v5833_v7 = vand.u32 4294901760, %v69_v29  ;;  %v7801_v1 = vand.u32 4294901760, %v5760_v5  ;;  %v5857_v51 = vsub.f32 %v54_v52, %v5826_v63 }
  0x89   :  { %v1130_v40 = vsub.f32 %v5665_v60, %v7798_v22  ;;  %4000 = vmatprep.subr.mxu1 %v1215_v0  ;;  %v7800_v22 = vand.u32 4294901760, %v5646_v31  ;;  %3975 = vmatprep.subr.mxu0 %v5631_v56  ;;  %v1236_v19 = vand.u32 4294901760, %v1235_v53  ;;  %v5842_v0 = vand.u32 4294901760, %v53_v23 }
  0x8a   :  { %3976 = vmatpush3.msra.mxu0 %v5649_v6  ;;  %v1249_v8 = vsub.f32 %v5760_v5, %v7801_v1  ;;  %7802 = vst [vmem:[#allocation34_spill] sm:$0xff] %v5857_v51  ;;  %v1243_v31 = vand.u32 4294901760, %v1242_v45  ;;  %v7808_v45 = vand.u32 4294901760, %v5748_v2 }
  0x8b   :  { %4001 = vmatpush3.msra.mxu1 %v7800_v22  ;;  %v5853_v22 = vsub.f32 %v70_v13, %v5794_v10  ;;  %3977 = vmatprep.subr.mxu0 %v5691_v48  ;;  %v1131_v53 = vand.u32 4294901760, %v1130_v40  ;;  %v7804_v13 = vand.u32 4294901760, %v5785_v57  ;;  %v5869_v40 = vsub.f32 %v69_v29, %v5833_v7 }
  0x8c   :  { %4002 = vmatprep.subr.mxu1 %v1222_v54  ;;  %v7803_v54 = vand.u32 4294901760, %v5707_v32  ;;  %3978 = vmatpush3.msra.mxu0 %v5693_v35  ;;  %v5873_v52 = vsub.f32 %v53_v23, %v5842_v0  ;;  %v1144_v1 = vsub.f32 %v5748_v2, %v7808_v45  ;;  %v1250_v29 = vand.u32 4294901760, %v1249_v8 }
  0x8d   :  { %4003 = vmatpush3.msra.mxu1 %v1110_v59  ;;  %v1256_v59 = vsub.f32 %v5785_v57, %v7804_v13  ;;  %7805 = vst [vmem:[#allocation35_spill] sm:$0xff] %v5869_v40  ;;  %3979 = vmatprep.subr.mxu0 %v5718_v34  ;;  %v7810_v23 = vand.u32 4294901760, %v5815_v37  ;;  %v7811_v13 = vand.u32 4294901760, %v5778_v42 }
  0x8e   :  { %v1137_v4 = vsub.f32 %v5707_v32, %v7803_v54  ;;  %4004 = vmatprep.subr.mxu1 %v1229_v24  ;;  %7806 = vst [vmem:[#allocation36_spill] sm:$0xff] %v5873_v52  ;;  %v7807_v24 = vand.u32 4294901760, %v5800_v30  ;;  %3980 = vmatpush3.msra.mxu0 %v5720_v21  ;;  %v7812_v21 = vand.u32 4294901760, %v5837_v18 }
  0x8f   :  { %4005 = vmatpush3.msra.mxu1 %v1117_v43  ;;  %v7809_v43 = vand.u32 4294901760, %v5811_v41  ;;  %v1263_v34 = vsub.f32 %v5815_v37, %v7810_v23  ;;  %3981 = vmatprep.subr.mxu0 %v5768_v49  ;;  %v7813_v49 = vand.u32 4294901760, %v5821_v50 }
  0x90   :  { %v1050_v54 = vsub.f32 %v5800_v30, %v7807_v24  ;;  %4006 = vmatprep.subr.mxu1 %v1236_v19  ;;  %v1138_v45 = vand.u32 4294901760, %v1137_v4  ;;  %v1151_v19 = vsub.f32 %v5778_v42, %v7811_v13  ;;  %3982 = vmatpush3.msra.mxu0 %v5770_v16  ;;  %v1270_v23 = vsub.f32 %v5837_v18, %v7812_v21 }
  0x91   :  { %v1056_v62 = vsub.f32 %v5811_v41, %v7809_v43  ;;  %4007 = vmatpush3.msra.mxu1 %v1124_v3  ;;  %v1257_v43 = vand.u32 4294901760, %v1256_v59  ;;  %3983 = vmatprep.subr.mxu0 %v5794_v10  ;;  %v1145_v3 = vand.u32 4294901760, %v1144_v1  ;;  %v1158_v13 = vsub.f32 %v5821_v50, %v7813_v49 }
  0x92   :  { %4008 = vmatprep.subr.mxu1 %v1243_v31  ;;  %v1051_v4 = vand.u32 4294901760, %v1050_v54  ;;  %v7499_v31 = vand.u32 4294901760, %v5873_v52  ;;  %3984 = vmatpush3.msra.mxu0 %v5826_v63  ;;  %v1264_v8 = vand.u32 4294901760, %v1263_v34  ;;  %v7814_v21 = vand.u32 4294901760, %v5853_v22 }
  0x93   :  { %4009 = vmatpush3.msra.mxu1 %v1131_v53  ;;  %v1057_v59 = vand.u32 4294901760, %v1056_v62  ;;  %3985 = vmatprep.subr.mxu0 %v5833_v7  ;;  %v1152_v53 = vand.u32 4294901760, %v1151_v19  ;;  %v7815_v1 = vand.u32 4294901760, %v5857_v51  ;;  %v1271_v49 = vand.u32 4294901760, %v1270_v23 }
  0x94   :  { %4010 = vmatprep.subr.mxu1 %v1250_v29  ;;  %v1277_v24 = vsub.f32 %v5853_v22, %v7814_v21  ;;  %3986 = vmatpush3.msra.mxu0 %v5842_v0  ;;  %v7816_v29 = vand.u32 4294901760, %v5869_v40  ;;  %v1159_v62 = vand.u32 4294901760, %v1158_v13  ;;  %v7820_v13 = vld [vmem:[#allocation23_spill] sm:$0xff]  ;;  %v7822_v21 = vld [vmem:[#allocation28_spill] sm:$0xff] }
  0x95   :  { %4011 = vmatpush3.msra.mxu1 %v1138_v45  ;;  %v1165_v54 = vsub.f32 %v5857_v51, %v7815_v1  ;;  %1052 = vmatprep.mubr.f32.mxu0 %v1051_v4  ;;  %v1172_v45 = vsub.f32 %v5873_v52, %v7499_v31  ;;  %v7824_v1 = vld [vmem:[#allocation10_spill] sm:$0xff] }
  0x96   :  { %4012 = vmatprep.subr.mxu1 %v1257_v43  ;;  %v1284_v34 = vsub.f32 %v5869_v40, %v7816_v29  ;;  %1058 = vmatmul.mubr.f32.vlgmr.msra.gmra.mxu0 %v1057_v59  ;;  %v1278_v19 = vand.u32 4294901760, %v1277_v24  ;;  %v7817_v24 = vld [vmem:[#allocation22_spill] sm:$0xff]  ;;  %v7821_v59 = vld [vmem:[#allocation8_spill] sm:$0xff]  ;;  %v7827_v29 = vld [vmem:[#allocation13_spill] sm:$0xff] }
  0x97   :  { %4013 = vmatpush3.msra.mxu1 %v1145_v3  ;;  %4025 = vmatprep.subr.mxu0 %v5383_v39  ;;  %v1166_v43 = vand.u32 4294901760, %v1165_v54  ;;  %v1173_v4 = vand.u32 4294901760, %v1172_v45  ;;  %v7819_v3 = vld [vmem:[#allocation20_spill] sm:$0xff]  ;;  %v7825_v54 = vld [vmem:[#allocation17_spill] sm:$0xff]  ;;  %v7830_v45 = vld [vmem:[#allocation14_spill] sm:$0xff] }
  0x98   :  { %4014 = vmatprep.subr.mxu1 %v1264_v8  ;;  %4026 = vmatpush3.msra.mxu0 %v5372_v26  ;;  %v1285_v23 = vand.u32 4294901760, %v1284_v34  ;;  %v7818_v8 = vld [vmem:[#allocation7_spill] sm:$0xff]  ;;  %v7828_v34 = vld [vmem:[#allocation12_spill] sm:$0xff]  ;;  %v7835_v31 = vld [vmem:[#allocation26_spill] sm:$0xff] }
  0x99   :  { %4015 = vmatpush3.msra.mxu1 %v1152_v53  ;;  %4027 = vmatprep.subr.mxu0 %v5389_v27  ;;  %v7823_v53 = vld [vmem:[#allocation9_spill] sm:$0xff] }
  0x9a   :  { %4016 = vmatprep.subr.mxu1 %v1271_v49  ;;  %4028 = vmatpush3.msra.mxu0 %v5395_v47  ;;  %v7826_v49 = vld [vmem:[#allocation11_spill] sm:$0xff] }
  0x9b   :  { %4017 = vmatpush3.msra.mxu1 %v1159_v62  ;;  %4029 = vmatprep.subr.mxu0 %v5421_v55  ;;  %v7829_v62 = vld [vmem:[#allocation15_spill] sm:$0xff] }
  0x9c   :  { %4018 = vmatprep.subr.mxu1 %v1278_v19  ;;  %4030 = vmatpush3.msra.mxu0 %v5438_v20  ;;  %v7831_v19 = vld [vmem:[#allocation21_spill] sm:$0xff] }
  0x9d   :  { %4019 = vmatpush3.msra.mxu1 %v1166_v43  ;;  %4031 = vmatprep.subr.mxu0 %v5453_v17  ;;  %v7832_v43 = vld [vmem:[#allocation6_spill] sm:$0xff] }
  0x9e   :  { %4020 = vmatprep.subr.mxu1 %v1285_v23  ;;  %4032 = vmatpush3.msra.mxu0 %v5445_v61  ;;  %v7833_v23 = vld [vmem:[#allocation24_spill] sm:$0xff] }
  0x9f   :  { %4021 = vmatpush3.msra.mxu1 %v1173_v4  ;;  %4033 = vmatprep.subr.mxu0 %v5486_v14  ;;  %v7834_v4 = vld [vmem:[#allocation25_spill] sm:$0xff] }
  0xa0   :  { %1290 = vmatmul.mubr.f32.vlgmr.msra.gmra.mxu1 %v5762_v44  ;;  %4060 = vmatprep.subr.mxu1 %v5345_v46  ;;  %v7836_v44 = vld [vmem:[#allocation16_spill] sm:$0xff] }
  0xa1   :  { %4034 = vmatpush3.msra.mxu0 %v5478_v11  ;;  %4061 = vmatpush3.msra.mxu1 %v5347_v58 }
  0xa2   :  { %4035 = vmatprep.subr.mxu0 %v5533_v33  ;;  %4062 = vmatprep.subr.mxu1 %v5352_v36 }
  0xa3   :  { %4036 = vmatpush3.msra.mxu0 %v5506_v28  ;;  %4063 = vmatpush3.msra.mxu1 %v7817_v24 }
  0xa4   :  { %4037 = vmatprep.subr.mxu0 %v5591_v25  ;;  %4064 = vmatprep.subr.mxu1 %v7818_v8 }
  0xa5   :  { %4038 = vmatpush3.msra.mxu0 %v7819_v3  ;;  %4065 = vmatpush3.msra.mxu1 %v7820_v13 }
  0xa6   :  { %4039 = vmatprep.subr.mxu0 %v5621_v15  ;;  %4066 = vmatprep.subr.mxu1 %v7821_v59 }
  0xa7   :  { %4040 = vmatpush3.msra.mxu0 %v7822_v21  ;;  %4067 = vmatpush3.msra.mxu1 %v7823_v53 }
  0xa8   :  { %4041 = vmatprep.subr.mxu0 %v5683_v12  ;;  %4068 = vmatprep.subr.mxu1 %v7824_v1 }
  0xa9   :  { %4042 = vmatpush3.msra.mxu0 %v7825_v54  ;;  %4069 = vmatpush3.msra.mxu1 %v7826_v49 }
  0xaa   :  { %4043 = vmatprep.subr.mxu0 %v5727_v9  ;;  %4070 = vmatprep.subr.mxu1 %v7827_v29 }
  0xab   :  { %4044 = vmatpush3.msra.mxu0 %v5665_v60  ;;  %4071 = vmatpush3.msra.mxu1 %v7828_v34 }
  0xac   :  { %4045 = vmatprep.subr.mxu0 %v5760_v5  ;;  %4072 = vmatprep.subr.mxu1 %v7829_v62 }
  0xad   :  { %4046 = vmatpush3.msra.mxu0 %v5707_v32  ;;  %4073 = vmatpush3.msra.mxu1 %v7830_v45 }
  0xae   :  { %4047 = vmatprep.subr.mxu0 %v5785_v57  ;;  %4074 = vmatprep.subr.mxu1 %v7831_v19 }
  0xaf   :  { %4048 = vmatpush3.msra.mxu0 %v5748_v2  ;;  %4075 = vmatpush3.msra.mxu1 %v7832_v43 }
  0xb0   :  { %4049 = vmatprep.subr.mxu0 %v5815_v37  ;;  %4076 = vmatprep.subr.mxu1 %v7833_v23 }
  0xb1   :  { %4050 = vmatpush3.msra.mxu0 %v5778_v42  ;;  %4077 = vmatpush3.msra.mxu1 %v7834_v4 }
  0xb2   :  { %4051 = vmatprep.subr.mxu0 %v5837_v18  ;;  %4078 = vmatprep.subr.mxu1 %v7835_v31 }
  0xb3   :  { %4052 = vmatpush3.msra.mxu0 %v5821_v50  ;;  %4079 = vmatpush3.msra.mxu1 %v7836_v44 }
  0xb4   :  { %4053 = vmatprep.subr.mxu0 %v5853_v22  ;;  %4080 = vmatprep.subr.mxu1 %v5631_v56  ;;  %v7838_v56 = vand.u32 4294901760, %v5383_v39  ;;  %v7844_v39 = vand.u32 4294901760, %v5421_v55  ;;  %v7849_v55 = vand.u32 4294901760, %v5811_v41 }
  0xb5   :  { %4054 = vmatpush3.msra.mxu0 %v5857_v51  ;;  %4081 = vmatpush3.msra.mxu1 %v5649_v6  ;;  %v7839_v51 = vld [vmem:[#allocation30_spill] sm:$0xff]  ;;  %v7840_v6 = vand.u32 4294901760, %v5372_v26  ;;  %v7845_v26 = vand.u32 4294901760, %v5438_v20  ;;  %v7851_v20 = vand.u32 4294901760, %v5478_v11  ;;  %v7859_v11 = vand.u32 4294901760, %v7825_v54 }
  0xb6   :  { %4055 = vmatprep.subr.mxu0 %v5869_v40  ;;  %4082 = vmatprep.subr.mxu1 %v5691_v48  ;;  %v7841_v40 = vld [vmem:[#allocation33_spill] sm:$0xff] }
  0xb7   :  { %4056 = vmatpush3.msra.mxu0 %v5873_v52  ;;  %1425 = vmatprep.mubr.f32.mxu0 %v5800_v30  ;;  %v7842_v52 = vand.u32 4294901760, %v5389_v27  ;;  %v7846_v27 = vand.u32 4294901760, %v5453_v17  ;;  %v7852_v17 = vand.u32 4294901760, %v5533_v33  ;;  %v7862_v33 = vand.u32 4294901760, %v5760_v5 }
  0xb8   :  { %4083 = vmatpush3.msra.mxu1 %v5693_v35  ;;  %1428 = vmatmul.mubr.f32.vlgmr.msra.gmra.mxu0 %v5811_v41  ;;  %v7843_v35 = vand.u32 4294901760, %v5395_v47  ;;  %v7847_v47 = vand.u32 4294901760, %v5800_v30  ;;  %v7860_v41 = vand.u32 4294901760, %v5727_v9  ;;  %v7866_v5 = vand.u32 4294901760, %v5815_v37  ;;  %v7872_v30 = vld [vmem:[#allocation34_spill] sm:$0xff] }
  0xb9   :  { %4084 = vmatprep.subr.mxu1 %v7837_v38  ;;  %4095 = vmatprep.subr.mxu0 %v7838_v56  ;;  %v7850_v56 = vand.u32 4294901760, %v5486_v14  ;;  %v7854_v14 = vand.u32 4294901760, %v5591_v25  ;;  %v7858_v25 = vand.u32 4294901760, %v5683_v12  ;;  %v7869_v12 = vand.u32 4294901760, %v5821_v50  ;;  %v7874_v37 = vld [vmem:[#allocation18_spill] sm:$0xff] }
  0xba   :  { %4085 = vmatpush3.msra.mxu1 %v7839_v51  ;;  %4096 = vmatpush3.msra.mxu0 %v7840_v6  ;;  %v7848_v6 = vand.u32 4294901760, %v5445_v61  ;;  %v7853_v61 = vand.u32 4294901760, %v5506_v28  ;;  %v7861_v28 = vand.u32 4294901760, %v5665_v60  ;;  %v7865_v60 = vand.u32 4294901760, %v5748_v2  ;;  %v7871_v2 = vld [vmem:[#allocation27_spill] sm:$0xff] }
  0xbb   :  { %4086 = vmatprep.subr.mxu1 %v7841_v40  ;;  %4097 = vmatprep.subr.mxu0 %v7842_v52  ;;  %v7870_v9 = vand.u32 4294901760, %v5853_v22  ;;  %v7875_v52 = vld [vmem:[#allocation35_spill] sm:$0xff]  ;;  %v7881_v22 = vld [vmem:[#allocation32_spill] sm:$0xff] }
  0xbc   :  { %4087 = vmatpush3.msra.mxu1 %v5770_v16  ;;  %4098 = vmatpush3.msra.mxu0 %v7843_v35  ;;  %v7864_v35 = vand.u32 4294901760, %v5785_v57  ;;  %v7868_v57 = vand.u32 4294901760, %v5837_v18  ;;  %v7876_v18 = vand.u32 4294901760, %v7875_v52 }
  0xbd   :  { %4088 = vmatprep.subr.mxu1 %v5794_v10  ;;  %4099 = vmatprep.subr.mxu0 %v7844_v39 }
  0xbe   :  { %4089 = vmatpush3.msra.mxu1 %v5826_v63  ;;  %4100 = vmatpush3.msra.mxu0 %v7845_v26 }
  0xbf   :  { %4090 = vmatprep.subr.mxu1 %v5833_v7  ;;  %4101 = vmatprep.subr.mxu0 %v7846_v27 }
  0xc0   :  { %4091 = vmatpush3.msra.mxu1 %v5842_v0  ;;  %1532 = vmatprep.mubr.f32.mxu1 %v7847_v47 }
  0xc1   :  { %4102 = vmatpush3.msra.mxu0 %v7848_v6  ;;  %1536 = vmatmul.mubr.f32.vlgmr.msra.gmra.mxu1 %v7849_v55 }
  0xc2   :  { %4103 = vmatprep.subr.mxu0 %v7850_v56  ;;  %4130 = vmatprep.subr.mxu1 %v5345_v46  ;;  %v7855_v46 = vand.u32 4294901760, %v7819_v3  ;;  %v4579_v3 = vld [vmem:[%s7364_s1 + $0x68] sm:$0xff] }
  0xc3   :  { %4104 = vmatpush3.msra.mxu0 %v7851_v20  ;;  %4131 = vmatpush3.msra.mxu1 %v5347_v58  ;;  %v7856_v58 = vand.u32 4294901760, %v5621_v15  ;;  %v7863_v15 = vand.u32 4294901760, %v5707_v32  ;;  %v7867_v32 = vand.u32 4294901760, %v5778_v42  ;;  %v7873_v42 = vand.u32 4294901760, %v7872_v30 }
  0xc4   :  { %4105 = vmatprep.subr.mxu0 %v7852_v17  ;;  %4132 = vmatprep.subr.mxu1 %v5352_v36  ;;  %v7857_v36 = vand.u32 4294901760, %v7822_v21  ;;  %v4580_v21 = vld [vmem:[%s7364_s1 + $0xf0] sm:$0xff] }
  0xc5   :  { %4106 = vmatpush3.msra.mxu0 %v7853_v61  ;;  %4133 = vmatpush3.msra.mxu1 %v7817_v24  ;;  %v7879_v24 = vld [vmem:[#allocation31_spill] sm:$0xff]  ;;  %v4583_v61 = vld [vmem:[%s7364_s1 + $0x58] sm:$0xff] }
  0xc6   :  { %4107 = vmatprep.subr.mxu0 %v7854_v14  ;;  %4134 = vmatprep.subr.mxu1 %v7818_v8  ;;  %v1855_v14 = vsel %vm1817_vm0, %v4583_v61, 0 }
  0xc7   :  { %4108 = vmatpush3.msra.mxu0 %v7855_v46  ;;  %4135 = vmatpush3.msra.mxu1 %v7820_v13  ;;  %v1861_v13 = vsel %vm1817_vm0, %v4579_v3, 0 }
  0xc8   :  { %4109 = vmatprep.subr.mxu0 %v7856_v58  ;;  %4136 = vmatprep.subr.mxu1 %v7821_v59 }
  0xc9   :  { %4110 = vmatpush3.msra.mxu0 %v7857_v36  ;;  %4137 = vmatpush3.msra.mxu1 %v7823_v53  ;;  %v1912_v53 = vsel %vm1817_vm0, %v4580_v21, 0  ;;  %v4584_v36 = vld [vmem:[%s7364_s1 + $0xe0] sm:$0xff]  ;;  %v4589_v21 = vld [vmem:[%s7364_s1 + $0xc8] sm:$0xff] }
  0xca   :  { %4111 = vmatprep.subr.mxu0 %v7858_v25  ;;  %4138 = vmatprep.subr.mxu1 %v7824_v1  ;;  %v6127_v54 = vand.u32 4294901760, %v1912_v53  ;;  %v1906_v25 = vsel %vm1817_vm0, %v4584_v36, 0 }
  0xcb   :  { %4112 = vmatpush3.msra.mxu0 %v7859_v11  ;;  %4139 = vmatpush3.msra.mxu1 %v7826_v49  ;;  %v4585_v11 = vld [vmem:[%s7364_s1 + $0x50] sm:$0xff] }
  0xcc   :  { %4113 = vmatprep.subr.mxu0 %v7860_v41  ;;  %4140 = vmatprep.subr.mxu1 %v7827_v29  ;;  %v6130_v29 = vand.u32 4294901760, %v1861_v13  ;;  %v1852_v41 = vsel %vm1817_vm0, %v4585_v11, 0 }
  0xcd   :  { %4114 = vmatpush3.msra.mxu0 %v7861_v28  ;;  %4141 = vmatpush3.msra.mxu1 %v7828_v34 }
  0xce   :  { %4115 = vmatprep.subr.mxu0 %v7862_v33  ;;  %4142 = vmatprep.subr.mxu1 %v7829_v62  ;;  %v6136_v62 = vsub.f32 %v1912_v53, %v6127_v54  ;;  %v6175_v58 = vsub.f32 %v1861_v13, %v6130_v29  ;;  %v1897_v53 = vsel %vm1817_vm0, %v4589_v21, 0 }
  0xcf   :  { %4116 = vmatpush3.msra.mxu0 %v7863_v15  ;;  %4143 = vmatpush3.msra.mxu1 %v7830_v45  ;;  %v4581_v45 = vld [vmem:[%s7364_s1 + $0x60] sm:$0xff]  ;;  %v6187_v15 = vand.u32 4294901760, %v1906_v25 }
  0xd0   :  { %4117 = vmatprep.subr.mxu0 %v7864_v35  ;;  %4144 = vmatprep.subr.mxu1 %v7831_v19  ;;  %v1858_v19 = vsel %vm1817_vm0, %v4581_v45, 0  ;;  %v7529_v27 = vand.u32 4294901760, %v6136_v62 }
  0xd1   :  { %4118 = vmatpush3.msra.mxu0 %v7865_v60  ;;  %4145 = vmatpush3.msra.mxu1 %v7832_v43  ;;  %v6158_v56 = vand.u32 4294901760, %v1858_v19  ;;  %v7524_v60 = vand.u32 4294901760, %v6175_v58 }
  0xd2   :  { %4119 = vmatprep.subr.mxu0 %v7866_v5  ;;  %4146 = vmatprep.subr.mxu1 %v7833_v23  ;;  %v2244_v20 = vsub.f32 %v6136_v62, %v7529_v27  ;;  %v6190_v5 = vand.u32 4294901760, %v1855_v14 }
  0xd3   :  { %4120 = vmatpush3.msra.mxu0 %v7867_v32  ;;  %4147 = vmatpush3.msra.mxu1 %v7834_v4  ;;  %v4582_v4 = vld [vmem:[%s7364_s1 + $0xe8] sm:$0xff]  ;;  %v2139_v30 = vsub.f32 %v6175_v58, %v7524_v60 }
  0xd4   :  { %4121 = vmatprep.subr.mxu0 %v7868_v57  ;;  %4148 = vmatprep.subr.mxu1 %v7835_v31  ;;  %v7877_v31 = vld [vmem:[#allocation36_spill] sm:$0xff]  ;;  %v1909_v39 = vsel %vm1817_vm0, %v4582_v4, 0  ;;  %v2245_v28 = vand.u32 4294901760, %v2244_v20  ;;  %v4586_v32 = vld [vmem:[%s7364_s1 + $0x48] sm:$0xff] }
  0xd5   :  { %4122 = vmatpush3.msra.mxu0 %v7869_v12  ;;  %4149 = vmatpush3.msra.mxu1 %v7836_v44  ;;  %v7878_v50 = vand.u32 4294901760, %v7877_v31  ;;  %v7880_v44 = vld [vmem:[#allocation19_spill] sm:$0xff]  ;;  %v6155_v47 = vand.u32 4294901760, %v1909_v39  ;;  %v1849_v57 = vsel %vm1817_vm0, %v4586_v32, 0 }
  0xd6   :  { %4123 = vmatprep.subr.mxu0 %v7870_v9  ;;  %4150 = vmatprep.subr.mxu1 %v7871_v2  ;;  %v6200_v9 = vsub.f32 %v1906_v25, %v6187_v15  ;;  %v6203_v2 = vand.u32 4294901760, %v1852_v41 }
  0xd7   :  { %4124 = vmatpush3.msra.mxu0 %v7873_v42  ;;  %4151 = vmatpush3.msra.mxu1 %v7874_v37  ;;  %v6164_v17 = vsub.f32 %v1909_v39, %v6155_v47  ;;  %v6209_v42 = vsub.f32 %v1858_v19, %v6158_v56  ;;  %v4587_v37 = vld [vmem:[%s7364_s1 + $0xd8] sm:$0xff] }
  0xd8   :  { %4125 = vmatprep.subr.mxu0 %v7876_v18  ;;  %4152 = vmatprep.subr.mxu1 %v5691_v48  ;;  %v1903_v52 = vsel %vm1817_vm0, %v4587_v37, 0  ;;  %v7523_v31 = vand.u32 4294901760, %v6200_v9  ;;  %v6242_v13 = vsub.f32 %v1852_v41, %v6203_v2 }
  0xd9   :  { %4126 = vmatpush3.msra.mxu0 %v7878_v50  ;;  %1702 = vmatprep.mubr.f32.mxu0 %v7879_v24  ;;  %v7527_v33 = vand.u32 4294901760, %v6164_v17  ;;  %v6217_v50 = vand.u32 4294901760, %v1903_v52 }
  0xda   :  { %4153 = vmatpush3.msra.mxu1 %v7880_v44  ;;  %1704 = vmatmul.mubr.f32.vlgmr.msra.gmra.mxu0 %v7881_v22  ;;  %v2140_v44 = vand.u32 4294901760, %v2139_v30 }
  0xdb   :  { %4154 = vmatprep.subr.mxu1 %v7837_v38  ;;  %1806 = vmatprep.mubr.f32.mxu1 %v7879_v24  ;;  %v2251_v12 = vsub.f32 %v6164_v17, %v7527_v33  ;;  %v6219_v24 = vand.u32 4294901760, %v1849_v57 }
  0xdc   :  { %4155 = vmatpush3.msra.mxu1 %v7839_v51  ;;  %v4576_v51 = vld [vmem:[%s7364_s1 + $0x78] sm:$0xff] }
  0xdd   :  { %4156 = vmatprep.subr.mxu1 %v7841_v40  ;;  %v1867_v48 = vsel %vm1817_vm0, %v4576_v51, 0  ;;  %v2252_v18 = vand.u32 4294901760, %v2251_v12  ;;  %v2258_v51 = vsub.f32 %v6200_v9, %v7523_v31 }
  0xde   :  { %4157 = vmatpush3.msra.mxu1 %v5770_v16  ;;  %v6096_v38 = vand.u32 4294901760, %v1867_v48  ;;  %v4577_v16 = vld [vmem:[%s7364_s1 + $0xf8] sm:$0xff] }
  0xdf   :  { %4158 = vmatprep.subr.mxu1 %v5794_v10  ;;  %v4578_v10 = vld [vmem:[%s7364_s1 + $0x70] sm:$0xff] }
  0xe0   :  { %4159 = vmatpush3.msra.mxu1 %v5826_v63  ;;  %v1915_v63 = vsel %vm1817_vm0, %v4577_v16, 0  ;;  %v6119_v59 = vsub.f32 %v1867_v48, %v6096_v38  ;;  %v6226_v48 = vsub.f32 %v1903_v52, %v6217_v50  ;;  %v6229_v16 = vsub.f32 %v1855_v14, %v6190_v5 }
  0xe1   :  { %4160 = vmatprep.subr.mxu1 %v5833_v7  ;;  %v1864_v7 = vsel %vm1817_vm0, %v4578_v10, 0 }
  0xe2   :  { %4161 = vmatpush3.msra.mxu1 %v5842_v0  ;;  %v6106_v0 = vand.u32 4294901760, %v1915_v63  ;;  %v6112_v8 = vand.u32 4294901760, %v1864_v7  ;;  %v7530_v49 = vand.u32 4294901760, %v6119_v59  ;;  %v7521_v45 = vand.u32 4294901760, %v6226_v48 }
  0xe3   :  { %1808 = vmatmul.mubr.f32.vlgmr.msra.gmra.mxu1 %v7881_v22  ;;  %v7522_v22 = vand.u32 4294901760, %v6209_v42  ;;  %v7518_v19 = vand.u32 4294901760, %v6229_v16 }
  0xe4   :  { %7882 = vst [vmem:[#allocation22_spill] sm:$0xff] %v6106_v0  ;;  %v6109_v40 = vsub.f32 %v1915_v63, %v6106_v0  ;;  %4165 = vmatprep.subr.mxu0 %v6106_v0  ;;  %v2125_v43 = vsub.f32 %v6119_v59, %v7530_v49  ;;  %v6147_v23 = vsub.f32 %v1864_v7, %v6112_v8  ;;  %v4588_v63 = vld [vmem:[%s7364_s1 + $0xd0] sm:$0xff] }
  0xe5   :  { %4166 = vmatpush3.xpose.msra.mxu0 %v6096_v38  ;;  %v1900_v10 = vsel %vm1817_vm0, %v4588_v63, 0  ;;  %v2146_v7 = vsub.f32 %v6209_v42, %v7522_v22  ;;  %v2265_v20 = vsub.f32 %v6226_v48, %v7521_v45  ;;  %v2153_v61 = vsub.f32 %v6229_v16, %v7518_v19  ;;  %v4592_v63 = vld [vmem:[%s7364_s1 + $0x38] sm:$0xff] }
  0xe6   :  { %7883 = vst [vmem:[#allocation7_spill] sm:$0xff] %v6109_v40  ;;  %v7533_v1 = vand.u32 4294901760, %v6109_v40  ;;  %4167 = vmatprep.subr.mxu0 %v6127_v54  ;;  %v2126_v6 = vand.u32 4294901760, %v2125_v43  ;;  %v7528_v55 = vand.u32 4294901760, %v6147_v23  ;;  %v6239_v3 = vand.u32 4294901760, %v1900_v10 }
  0xe7   :  { %v6251_v43 = vand.u32 4294901760, %v1897_v53  ;;  %v2147_v4 = vand.u32 4294901760, %v2146_v7 }
  0xe8   :  { %v2237_v34 = vsub.f32 %v6109_v40, %v7533_v1  ;;  %v2132_v46 = vsub.f32 %v6147_v23, %v7528_v55  ;;  %v6254_v39 = vsub.f32 %v1900_v10, %v6239_v3  ;;  %v1843_v10 = vsel %vm1817_vm0, %v4592_v63, 0 }
  0xe9   :  { %4168 = vmatpush3.xpose.msra.mxu0 %v6112_v8  ;;  %v6268_v14 = vsub.f32 %v1897_v53, %v6251_v43 }
  0xea   :  { %v2238_v26 = vand.u32 4294901760, %v2237_v34  ;;  %4169 = vmatprep.subr.mxu0 %v6155_v47  ;;  %v2133_v35 = vand.u32 4294901760, %v2132_v46  ;;  %v2259_v34 = vand.u32 4294901760, %v2258_v51  ;;  %v4590_v46 = vld [vmem:[%s7364_s1 + $0x40] sm:$0xff]  ;;  %v7517_v25 = vand.u32 4294901760, %v6254_v39 }
  0xeb   :  { %v1846_v36 = vsel %vm1817_vm0, %v4590_v46, 0  ;;  %v7515_v32 = vand.u32 4294901760, %v6268_v14 }
  0xec   :  { %4199 = vmatprep.subr.mxu1 %v2238_v26  ;;  %v7516_v26 = vand.u32 4294901760, %v6242_v13  ;;  %v6285_v12 = vand.u32 4294901760, %v1846_v36 }
  0xed   :  { %4200 = vmatpush3.xpose.msra.mxu1 %v2126_v6  ;;  %4170 = vmatpush3.xpose.msra.mxu0 %v6130_v29  ;;  %v6258_v6 = vsub.f32 %v1849_v57, %v6219_v24  ;;  %v2272_v57 = vsub.f32 %v6254_v39, %v7517_v25  ;;  %v2279_v30 = vsub.f32 %v6268_v14, %v7515_v32 }
  0xee   :  { %4201 = vmatprep.subr.mxu1 %v2245_v28  ;;  %4171 = vmatprep.subr.mxu0 %v6187_v15  ;;  %v2160_v11 = vsub.f32 %v6242_v13, %v7516_v26  ;;  %v2266_v28 = vand.u32 4294901760, %v2265_v20  ;;  %v6311_v20 = vsub.f32 %v1846_v36, %v6285_v12 }
  0xef   :  { %v7512_v41 = vand.u32 4294901760, %v6258_v6  ;;  %v2273_v37 = vand.u32 4294901760, %v2272_v57  ;;  %v2280_v7 = vand.u32 4294901760, %v2279_v30 }
  0xf0   :  { %v2161_v52 = vand.u32 4294901760, %v2160_v11  ;;  %7884 = vst [vmem:[#allocation20_spill] sm:$0xff] %v6311_v20  ;;  %v4594_v11 = vld [vmem:[%s7364_s1 + $0x30] sm:$0xff]  ;;  %v7510_v36 = vand.u32 4294901760, %v6311_v20 }
  0xf1   :  { %4202 = vmatpush3.xpose.msra.mxu1 %v2133_v35  ;;  %4172 = vmatpush3.xpose.msra.mxu0 %v6158_v56  ;;  %v2154_v35 = vand.u32 4294901760, %v2153_v61  ;;  %v4593_v61 = vld [vmem:[%s7364_s1 + $0xb8] sm:$0xff] }
  0xf2   :  { %4203 = vmatprep.subr.mxu1 %v2252_v18  ;;  %4173 = vmatprep.subr.mxu0 %v6217_v50  ;;  %v2167_v18 = vsub.f32 %v6258_v6, %v7512_v41  ;;  %v1891_v46 = vsel %vm1817_vm0, %v4593_v61, 0 }
  0xf3   :  { %v6323_v57 = vand.u32 4294901760, %v1891_v46 }
  0xf5   :  { %4204 = vmatpush3.xpose.msra.mxu1 %v2140_v44  ;;  %4174 = vmatpush3.xpose.msra.mxu0 %v6190_v5  ;;  %v4591_v44 = vld [vmem:[%s7364_s1 + $0xc0] sm:$0xff] }
  0xf6   :  { %4175 = vmatprep.subr.mxu0 %v6239_v3  ;;  %4205 = vmatprep.subr.mxu1 %v2259_v34  ;;  %v1894_v51 = vsel %vm1817_vm0, %v4591_v44, 0  ;;  %v6308_v34 = vand.u32 4294901760, %v1843_v10 }
  0xf7   :  { %v6302_v21 = vand.u32 4294901760, %v1894_v51 }
  0xf8   :  { %v6339_v44 = vsub.f32 %v1843_v10, %v6308_v34 }
  0xf9   :  { %4206 = vmatpush3.xpose.msra.mxu1 %v2147_v4  ;;  %4176 = vmatpush3.xpose.msra.mxu0 %v6203_v2  ;;  %v6305_v53 = vsub.f32 %v1894_v51, %v6302_v21  ;;  %v2168_v4 = vand.u32 4294901760, %v2167_v18  ;;  %v2174_v18 = vsub.f32 %v6311_v20, %v7510_v36  ;;  %v4595_v51 = vld [vmem:[%s7364_s1 + $0xb0] sm:$0xff] }
  0xfa   :  { %4177 = vmatprep.subr.mxu0 %v6251_v43  ;;  %4207 = vmatprep.subr.mxu1 %v2266_v28  ;;  %v1840_v28 = vsel %vm1817_vm0, %v4594_v11, 0  ;;  %7887 = vst [vmem:[#allocation28_spill] sm:$0xff] %v6339_v44  ;;  %v1888_v63 = vsel %vm1817_vm0, %v4595_v51, 0  ;;  %v7514_v36 = vand.u32 4294901760, %v6339_v44 }
  0xfb   :  { %v6351_v11 = vand.u32 4294901760, %v1888_v63  ;;  %v2175_v10 = vand.u32 4294901760, %v2174_v18 }
  0xfd   :  { %4208 = vmatpush3.xpose.msra.mxu1 %v2154_v35  ;;  %4178 = vmatpush3.xpose.msra.mxu0 %v6219_v24  ;;  %v7511_v35 = vand.u32 4294901760, %v6305_v53 }
  0xfe   :  { %4209 = vmatprep.subr.mxu1 %v2273_v37  ;;  %4179 = vmatprep.subr.mxu0 %v6302_v21  ;;  %v6330_v37 = vsub.f32 %v1891_v46, %v6323_v57 }
  0xff   :  { %v2286_v30 = vsub.f32 %v6305_v53, %v7511_v35  ;;  %v6358_v35 = vsub.f32 %v1888_v63, %v6351_v11  ;;  %v4598_v63 = vld [vmem:[%s7364_s1 + $0x20] sm:$0xff] }
 0x100   :  { %7885 = vst [vmem:[#allocation23_spill] sm:$0xff] %v6330_v37  ;;  %v7513_v46 = vand.u32 4294901760, %v6330_v37 }
 0x101   :  { %4210 = vmatpush3.xpose.msra.mxu1 %v2161_v52  ;;  %4180 = vmatpush3.xpose.msra.mxu0 %v6285_v12  ;;  %v6333_v52 = vand.u32 4294901760, %v1840_v28  ;;  %v2287_v61 = vand.u32 4294901760, %v2286_v30  ;;  %7888 = vst [vmem:[#allocation9_spill] sm:$0xff] %v6358_v35  ;;  %v2181_v30 = vsub.f32 %v6339_v44, %v7514_v36  ;;  %v7519_v36 = vand.u32 4294901760, %v6358_v35 }
 0x102   :  { %4211 = vmatprep.subr.mxu1 %v2280_v7  ;;  %4181 = vmatprep.subr.mxu0 %v6323_v57  ;;  %v4596_v7 = vld [vmem:[%s7364_s1 + $0x28] sm:$0xff]  ;;  %v2293_v51 = vsub.f32 %v6330_v37, %v7513_v46 }
 0x103   :  { %7886 = vst [vmem:[#allocation8_spill] sm:$0xff] %v6333_v52  ;;  %v6367_v18 = vsub.f32 %v1840_v28, %v6333_v52  ;;  %v2182_v28 = vand.u32 4294901760, %v2181_v30 }
 0x104   :  { %v2294_v46 = vand.u32 4294901760, %v2293_v51 }
 0x105   :  { %4212 = vmatpush3.xpose.msra.mxu1 %v2168_v4  ;;  %4182 = vmatpush3.xpose.msra.mxu0 %v6308_v34  ;;  %v1837_v4 = vsel %vm1817_vm0, %v4596_v7, 0  ;;  %7890 = vst [vmem:[#allocation17_spill] sm:$0xff] %v6367_v18  ;;  %v4597_v7 = vld [vmem:[%s7364_s1 + $0xa8] sm:$0xff]  ;;  %v7520_v26 = vand.u32 4294901760, %v6367_v18 }
 0x106   :  { %4213 = vmatprep.subr.mxu1 %v2287_v61  ;;  %4183 = vmatprep.subr.mxu0 %v6351_v11  ;;  %v6361_v41 = vand.u32 4294901760, %v1837_v4  ;;  %v1885_v61 = vsel %vm1817_vm0, %v4597_v7, 0  ;;  %v2300_v7 = vsub.f32 %v6358_v35, %v7519_v36 }
 0x107   :  { %v6379_v32 = vand.u32 4294901760, %v1885_v61  ;;  %v2188_v51 = vsub.f32 %v6367_v18, %v7520_v26 }
 0x108   :  { %7889 = vst [vmem:[#allocation10_spill] sm:$0xff] %v6361_v41  ;;  %v6395_v30 = vsub.f32 %v1837_v4, %v6361_v41  ;;  %v2301_v36 = vand.u32 4294901760, %v2300_v7 }
 0x109   :  { %4214 = vmatpush3.xpose.msra.mxu1 %v2175_v10  ;;  %4184 = vmatpush3.xpose.msra.mxu0 %v6333_v52  ;;  %v1834_v10 = vsel %vm1817_vm0, %v4598_v63, 0  ;;  %7891 = vst [vmem:[#allocation11_spill] sm:$0xff] %v6379_v32  ;;  %v6386_v25 = vsub.f32 %v1885_v61, %v6379_v32  ;;  %v4600_v61 = vld [vmem:[%s7364_s1 + $0x18] sm:$0xff]  ;;  %v2189_v4 = vand.u32 4294901760, %v2188_v51 }
 0x10a   :  { %4215 = vmatprep.subr.mxu1 %v2294_v46  ;;  %4185 = vmatprep.subr.mxu0 %v6379_v32  ;;  %v6389_v19 = vand.u32 4294901760, %v1834_v10  ;;  %7894 = vst [vmem:[#allocation15_spill] sm:$0xff] %v6395_v30  ;;  %v4599_v46 = vld [vmem:[%s7364_s1 + $0xa0] sm:$0xff]  ;;  %v7526_v22 = vand.u32 4294901760, %v6395_v30 }
 0x10b   :  { %7892 = vst [vmem:[#allocation13_spill] sm:$0xff] %v6386_v25  ;;  %v1882_v63 = vsel %vm1817_vm0, %v4599_v46, 0  ;;  %v7525_v26 = vand.u32 4294901760, %v6386_v25 }
 0x10c   :  { %7893 = vst [vmem:[#allocation12_spill] sm:$0xff] %v6389_v19  ;;  %v6407_v45 = vand.u32 4294901760, %v1882_v63  ;;  %v2195_v7 = vsub.f32 %v6395_v30, %v7526_v22  ;;  %v6423_v51 = vsub.f32 %v1834_v10, %v6389_v19 }
 0x10d   :  { %4216 = vmatpush3.xpose.msra.mxu1 %v2182_v28  ;;  %4186 = vmatpush3.xpose.msra.mxu0 %v6361_v41  ;;  %v1831_v28 = vsel %vm1817_vm0, %v4600_v61, 0  ;;  %v2307_v46 = vsub.f32 %v6386_v25, %v7525_v26 }
 0x10e   :  { %7895 = vst [vmem:[#allocation14_spill] sm:$0xff] %v6407_v45  ;;  %4217 = vmatprep.subr.mxu1 %v2301_v36  ;;  %v6414_v31 = vsub.f32 %v1882_v63, %v6407_v45  ;;  %4187 = vmatprep.subr.mxu0 %v6407_v45  ;;  %v6417_v60 = vand.u32 4294901760, %v1831_v28  ;;  %7898 = vst [vmem:[#allocation24_spill] sm:$0xff] %v6423_v51  ;;  %v4601_v36 = vld [vmem:[%s7364_s1 + $0x98] sm:$0xff]  ;;  %v4602_v63 = vld [vmem:[%s7364_s1 + $0x10] sm:$0xff]  ;;  %v2196_v10 = vand.u32 4294901760, %v2195_v7 }
 0x10f   :  { %v1879_v61 = vsel %vm1817_vm0, %v4601_v36, 0  ;;  %v2308_v26 = vand.u32 4294901760, %v2307_v46  ;;  %v7532_v55 = vand.u32 4294901760, %v6423_v51 }
 0x110   :  { %7896 = vst [vmem:[#allocation21_spill] sm:$0xff] %v6414_v31  ;;  %7897 = vst [vmem:[#allocation6_spill] sm:$0xff] %v6417_v60  ;;  %v7531_v22 = vand.u32 4294901760, %v6414_v31  ;;  %v6435_v33 = vand.u32 4294901760, %v1879_v61  ;;  %v6451_v7 = vsub.f32 %v1831_v28, %v6417_v60 }
 0x111   :  { %4218 = vmatpush3.xpose.msra.mxu1 %v2189_v4  ;;  %4188 = vmatpush3.xpose.msra.mxu0 %v6389_v19  ;;  %v1828_v4 = vsel %vm1817_vm0, %v4602_v63, 0  ;;  %v2202_v46 = vsub.f32 %v6423_v51, %v7532_v55 }
 0x112   :  { %7899 = vst [vmem:[#allocation25_spill] sm:$0xff] %v6435_v33  ;;  %4219 = vmatprep.subr.mxu1 %v2308_v26  ;;  %v2314_v36 = vsub.f32 %v6414_v31, %v7531_v22  ;;  %v6442_v27 = vsub.f32 %v1879_v61, %v6435_v33  ;;  %4189 = vmatprep.subr.mxu0 %v6435_v33  ;;  %v6445_v49 = vand.u32 4294901760, %v1828_v4  ;;  %7902 = vst [vmem:[#allocation29_spill] sm:$0xff] %v6451_v7  ;;  %v4603_v26 = vld [vmem:[%s7364_s1 + $0x90] sm:$0xff]  ;;  %v4604_v61 = vld [vmem:[%s7364_s1 + $0x8] sm:$0xff] }
 0x113   :  { %v1876_v63 = vsel %vm1817_vm0, %v4603_v26, 0  ;;  %v2203_v28 = vand.u32 4294901760, %v2202_v46  ;;  %v7541_v51 = vand.u32 4294901760, %v6451_v7 }
 0x114   :  { %7900 = vst [vmem:[#allocation26_spill] sm:$0xff] %v6442_v27  ;;  %7901 = vst [vmem:[#allocation16_spill] sm:$0xff] %v6445_v49  ;;  %v2315_v22 = vand.u32 4294901760, %v2314_v36  ;;  %v7540_v55 = vand.u32 4294901760, %v6442_v27  ;;  %v6463_v1 = vand.u32 4294901760, %v1876_v63  ;;  %v6479_v46 = vsub.f32 %v1828_v4, %v6445_v49 }
 0x115   :  { %4220 = vmatpush3.xpose.msra.mxu1 %v2196_v10  ;;  %4190 = vmatpush3.xpose.msra.mxu0 %v6417_v60  ;;  %v1825_v10 = vsel %vm1817_vm0, %v4604_v61, 0  ;;  %v2209_v36 = vsub.f32 %v6451_v7, %v7541_v51 }
 0x116   :  { %7903 = vst [vmem:[#allocation30_spill] sm:$0xff] %v6463_v1  ;;  %4221 = vmatprep.subr.mxu1 %v2315_v22  ;;  %v2321_v26 = vsub.f32 %v6442_v27, %v7540_v55  ;;  %v6470_v31 = vsub.f32 %v1876_v63, %v6463_v1  ;;  %4191 = vmatprep.subr.mxu0 %v6463_v1  ;;  %v6473_v60 = vand.u32 4294901760, %v1825_v10  ;;  %7906 = vst [vmem:[#allocation34_spill] sm:$0xff] %v6479_v46  ;;  %v4605_v22 = vld [vmem:[%s7364_s1 + $0x88] sm:$0xff]  ;;  %v4606_v63 = vld [vmem:[%s7364_s1] sm:$0xff] }
 0x117   :  { %v1873_v61 = vsel %vm1817_vm0, %v4605_v22, 0  ;;  %v2210_v4 = vand.u32 4294901760, %v2209_v36  ;;  %v7555_v27 = vand.u32 4294901760, %v6479_v46 }
 0x118   :  { %7904 = vst [vmem:[#allocation33_spill] sm:$0xff] %v6470_v31  ;;  %7905 = vst [vmem:[#allocation27_spill] sm:$0xff] %v6473_v60  ;;  %v2322_v55 = vand.u32 4294901760, %v2321_v26  ;;  %v7550_v51 = vand.u32 4294901760, %v6470_v31  ;;  %v6491_v7 = vand.u32 4294901760, %v1873_v61  ;;  %v6507_v36 = vsub.f32 %v1825_v10, %v6473_v60 }
 0x119   :  { %4222 = vmatpush3.xpose.msra.mxu1 %v2203_v28  ;;  %4192 = vmatpush3.xpose.msra.mxu0 %v6445_v49  ;;  %v1822_v28 = vsel %vm1817_vm0, %v4606_v63, 0  ;;  %v2216_v26 = vsub.f32 %v6479_v46, %v7555_v27 }
 0x11a   :  { %7907 = vst [vmem:[#allocation18_spill] sm:$0xff] %v6491_v7  ;;  %4223 = vmatprep.subr.mxu1 %v2322_v55  ;;  %v2328_v22 = vsub.f32 %v6470_v31, %v7550_v51  ;;  %v6498_v49 = vsub.f32 %v1873_v61, %v6491_v7  ;;  %4193 = vmatprep.subr.mxu0 %v6491_v7  ;;  %v6501_v1 = vand.u32 4294901760, %v1822_v28  ;;  %7910 = vst [vmem:[#allocation31_spill] sm:$0xff] %v6507_v36  ;;  %v4607_v55 = vld [vmem:[%s7364_s1 + $0x80] sm:$0xff] }
 0x11b   :  { %v1870_v63 = vsel %vm1817_vm0, %v4607_v55, 0  ;;  %v7557_v7 = vand.u32 4294901760, %v6507_v36 }
 0x11c   :  { %7908 = vst [vmem:[#allocation35_spill] sm:$0xff] %v6498_v49  ;;  %7909 = vst [vmem:[#allocation36_spill] sm:$0xff] %v6501_v1  ;;  %v2329_v61 = vand.u32 4294901760, %v2328_v22  ;;  %v7556_v51 = vand.u32 4294901760, %v6498_v49  ;;  %v6515_v31 = vand.u32 4294901760, %v1870_v63  ;;  %v6529_v55 = vsub.f32 %v1822_v28, %v6501_v1 }
 0x11d   :  { %4224 = vmatpush3.xpose.msra.mxu1 %v2210_v4  ;;  %4194 = vmatpush3.xpose.msra.mxu0 %v6473_v60  ;;  %v2217_v4 = vand.u32 4294901760, %v2216_v26  ;;  %v2223_v22 = vsub.f32 %v6507_v36, %v7557_v7 }
 0x11e   :  { %7911 = vst [vmem:[#allocation19_spill] sm:$0xff] %v6515_v31  ;;  %4225 = vmatprep.subr.mxu1 %v2329_v61  ;;  %v2335_v10 = vsub.f32 %v6498_v49, %v7556_v51  ;;  %v6522_v27 = vsub.f32 %v1870_v63, %v6515_v31  ;;  %4195 = vmatprep.subr.mxu0 %v6515_v31  ;;  %7913 = vst [vmem:[#allocation37_spill] sm:$0xff] %v6529_v55  ;;  %v7576_v63 = vand.u32 4294901760, %v6529_v55 }
 0x11f   :  { %v2224_v51 = vand.u32 4294901760, %v2223_v22 }
 0x120   :  { %7912 = vst [vmem:[#allocation32_spill] sm:$0xff] %v6522_v27  ;;  %v2336_v26 = vand.u32 4294901760, %v2335_v10  ;;  %v7569_v61 = vand.u32 4294901760, %v6522_v27  ;;  %v2230_v28 = vsub.f32 %v6529_v55, %v7576_v63  ;;  %v3777_v10 = vpop.f32.mrf.mxu0 }
 0x121   :  { %4226 = vmatpush3.xpose.msra.mxu1 %v2217_v4  ;;  %4196 = vmatpush3.xpose.msra.mxu0 %v6501_v1 }
 0x122   :  { %4233 = vmatprep.subr.mxu0 %v6109_v40  ;;  %4227 = vmatprep.subr.mxu1 %v2336_v26  ;;  %v2342_v4 = vsub.f32 %v6522_v27, %v7569_v61  ;;  %v2231_v36 = vand.u32 4294901760, %v2230_v28  ;;  %v3778_v22 = vpop.f32.mrf.mxu0  ;;  %v3812_v40 = vpop.f32.mrf.mxu1 }
 0x124   :  { %v2343_v7 = vand.u32 4294901760, %v2342_v4  ;;  %v3847_v49 = vpop.f32.mrf.mxu0  ;;  %v3813_v26 = vpop.f32.mrf.mxu1  ;;  %v3779_v4 = vadd.f32 %v3778_v22, %v3777_v10 }
 0x125   :  { %4228 = vmatpush3.xpose.msra.mxu1 %v2224_v51  ;;  %v3814_v30 = vadd.f32 %v3813_v26, %v3812_v40 }
 0x126   :  { %4229 = vmatprep.subr.mxu1 %v2343_v7  ;;  %v3848_v1 = vpop.f32.mrf.mxu0  ;;  %v3882_v46 = vpop.f32.mrf.mxu1 }
 0x127   :  { %v3849_v28 = vadd.f32 %v3848_v1, %v3847_v49  ;;  %v430_v55 = vadd.f32 %v3814_v30, %v3779_v4  ;;  %v7918_v4 = vld [vmem:[#allocation11_spill] sm:$0xff] }
 0x128   :  { %v3883_v61 = vpop.f32.mrf.mxu1 }
 0x129   :  { %4230 = vmatpush3.xpose.msra.mxu1 %v2231_v36  ;;  %v568_v25 = vadd.f32 %v3849_v28, %v430_v55  ;;  %v7919_v28 = vld [vmem:[#allocation28_spill] sm:$0xff] }
 0x12a   :  { %4267 = vmatprep.subr.mxu1 %v6106_v0  ;;  %v3884_v0 = vadd.f32 %v3883_v61, %v3882_v46 }
 0x12c   :  { %v676_v45 = vadd.f32 %v3884_v0, %v568_v25 }
 0x133   :  { %v3917_v31 = vpop.f32.mrf.mxu0 }
 0x135   :  { %v3918_v51 = vpop.f32.mrf.mxu0 }
 0x136   :  { %v3919_v19 = vadd.f32 %v3918_v51, %v3917_v31 }
 0x138   :  { %v844_v32 = vadd.f32 %v3919_v19, %v676_v45 }
 0x13c   :  { %v3952_v27 = vpop.f32.mrf.mxu1 }
 0x13e   :  { %v3953_v63 = vpop.f32.mrf.mxu1 }
 0x13f   :  { %v3954_v35 = vadd.f32 %v3953_v63, %v3952_v27 }
 0x141   :  { %v948_v20 = vadd.f32 %v3954_v35, %v844_v32 }
 0x156   :  { %v3987_v60 = vpop.f32.mrf.mxu0 }
 0x158   :  { %v3988_v7 = vpop.f32.mrf.mxu0 }
 0x159   :  { %v3989_v37 = vadd.f32 %v3988_v7, %v3987_v60  ;;  %v1815_v60 = vstv %s7363_s0  ;;  %v7920_v7 = vld [vmem:[#allocation10_spill] sm:$0xff] }
 0x15b   :  { %v1060_v10 = vadd.f32 %v3989_v37, %v948_v20 }
 0x160   :  { %v4022_v36 = vpop.f32.mrf.mxu1 }
 0x162   :  { %v4023_v18 = vpop.f32.mrf.mxu1 }
 0x163   :  { %v4024_v40 = vadd.f32 %v4023_v18, %v4022_v36  ;;  %v7917_v18 = vld [vmem:[#allocation23_spill] sm:$0xff]  ;;  %v7921_v36 = vld [vmem:[#allocation9_spill] sm:$0xff] }
 0x165   :  { %v1292_v22 = vadd.f32 %v4024_v40, %v1060_v10  ;;  %v7922_v40 = vld [vmem:[#allocation14_spill] sm:$0xff]  ;;  %v7924_v10 = vld [vmem:[#allocation12_spill] sm:$0xff] }
 0x178   :  { %v4057_v33 = vpop.f32.mrf.mxu0 }
 0x17a   :  { %v4058_v41 = vpop.f32.mrf.mxu0 }
 0x17b   :  { %v4059_v1 = vadd.f32 %v4058_v41, %v4057_v33 }
 0x17d   :  { %v1430_v46 = vadd.f32 %v4059_v1, %v1292_v22  ;;  %v7925_v1 = vld [vmem:[#allocation13_spill] sm:$0xff]  ;;  %v7927_v22 = vld [vmem:[#allocation15_spill] sm:$0xff] }
 0x181   :  { %v4092_v44 = vpop.f32.mrf.mxu1 }
 0x183   :  { %v4093_v26 = vpop.f32.mrf.mxu1 }
 0x184   :  { %v4094_v30 = vadd.f32 %v4093_v26, %v4092_v44  ;;  %v7916_v44 = vld [vmem:[#allocation8_spill] sm:$0xff]  ;;  %v7923_v26 = vld [vmem:[#allocation17_spill] sm:$0xff] }
 0x186   :  { %v1538_v31 = vadd.f32 %v4094_v30, %v1430_v46  ;;  %v7928_v30 = vld [vmem:[#allocation6_spill] sm:$0xff]  ;;  %v7929_v46 = vld [vmem:[#allocation21_spill] sm:$0xff] }
 0x19a   :  { %v4127_v52 = vpop.f32.mrf.mxu0 }
 0x19c   :  { %v4128_v49 = vpop.f32.mrf.mxu0 }
 0x19d   :  { %v4129_v61 = vadd.f32 %v4128_v49, %v4127_v52  ;;  %v7915_v52 = vld [vmem:[#allocation20_spill] sm:$0xff]  ;;  %v7926_v49 = vld [vmem:[#allocation25_spill] sm:$0xff] }
 0x19f   :  { %v1706_v0 = vadd.f32 %v4129_v61, %v1538_v31  ;;  %v7930_v61 = vld [vmem:[#allocation30_spill] sm:$0xff]  ;;  %v7932_v31 = vld [vmem:[#allocation16_spill] sm:$0xff] }
 0x1a3   :  { %v4162_v55 = vpop.f32.mrf.mxu1 }
 0x1a5   :  { %v4163_v51 = vpop.f32.mrf.mxu1 }
 0x1a6   :  { %v4164_v27 = vadd.f32 %v4163_v51, %v4162_v55  ;;  %v7931_v55 = vld [vmem:[#allocation24_spill] sm:$0xff]  ;;  %v7933_v51 = vld [vmem:[#allocation26_spill] sm:$0xff] }
 0x1a8   :  { %v1810_v25 = vadd.f32 %v4164_v27, %v1706_v0  ;;  %v7934_v0 = vld [vmem:[#allocation18_spill] sm:$0xff]  ;;  %v7935_v27 = vld [vmem:[#allocation29_spill] sm:$0xff] }
 0x1aa   :  { %v1813_v63 = vmax.f32 %v1810_v25, 1e-10  ;;  %v7936_v25 = vld [vmem:[#allocation27_spill] sm:$0xff] }
 0x1ac   :  { %4574 = vrsqrt.f32 %v1813_v63  ;;  %v7937_v63 = vld [vmem:[#allocation33_spill] sm:$0xff] }
 0x1b9   :  { %v4575_v45 = vpop.eup %4574 }
 0x1ba   :  { %v1816_v19 = vmul.f32 %v4575_v45, %v1815_v60  ;;  %v7938_v60 = vld [vmem:[#allocation19_spill] sm:$0xff]  ;;  %v7939_v45 = vld [vmem:[#allocation34_spill] sm:$0xff] }
 0x1bc   :  { %v1819_v33 = vsel %vm1817_vm0, %v1816_v19, 0  ;;  %v7940_v19 = vld [vmem:[#allocation36_spill] sm:$0xff] }
 0x1bd   :  { %v6546_v41 = vand.u32 4294901760, %v1819_v33 }
 0x1bf   :  { %v6549_v32 = vsub.f32 %v1819_v33, %v6546_v41  ;;  %4231 = vmatprep.mubr.f32.mxu1 %v6546_v41  ;;  %v7941_v33 = vld [vmem:[#allocation35_spill] sm:$0xff] }
 0x1c0   :  { %4232 = vmatmul.mubr.f32.vlgmr.msra.gmra.mxu1 %v6546_v41 }
 0x1c1   :  { %4268 = vmatpush3.xpose.msra.mxu1 %v6096_v38  ;;  %v6555_v20 = vand.u32 4294901760, %v6549_v32 }
 0x1c2   :  { %4269 = vmatprep.subr.mxu1 %v6127_v54 }
 0x1c3   :  { %4299 = vmatprep.mubr.f32.mxu1 %v6555_v20  ;;  %v2113_v35 = vsub.f32 %v6549_v32, %v6555_v20 }
 0x1c5   :  { %4270 = vmatpush3.xpose.msra.mxu1 %v6112_v8  ;;  %v6562_v37 = vand.u32 4294901760, %v2113_v35  ;;  %v7942_v35 = vld [vmem:[#allocation22_spill] sm:$0xff] }
 0x1c6   :  { %4271 = vmatprep.subr.mxu1 %v6155_v47 }
 0x1c7   :  { %7914 = vst [vmem:[#allocation38_spill] sm:$0xff] %v6562_v37  ;;  %4197 = vmatprep.mubr.f32.mxu0 %v6562_v37 }
 0x1c8   :  { %4198 = vmatmul.mubr.f32.vlgmr.msra.gmra.mxu0 %v6562_v37  ;;  %v7943_v37 = vld [vmem:[#allocation31_spill] sm:$0xff] }
 0x1c9   :  { %4234 = vmatpush3.xpose.msra.mxu0 %v6119_v59  ;;  %4272 = vmatpush3.xpose.msra.mxu1 %v6130_v29 }
 0x1ca   :  { %4265 = vmatprep.mubr.f32.mxu0 %v6549_v32  ;;  %4235 = vmatprep.subr.mxu0 %v6136_v62 }
 0x1cb   :  { %4273 = vmatprep.subr.mxu1 %v6187_v15 }
 0x1cd   :  { %4236 = vmatpush3.xpose.msra.mxu0 %v6147_v23  ;;  %4274 = vmatpush3.xpose.msra.mxu1 %v6158_v56 }
 0x1ce   :  { %4237 = vmatprep.subr.mxu0 %v6164_v17  ;;  %4275 = vmatprep.subr.mxu1 %v6217_v50 }
 0x1d1   :  { %4238 = vmatpush3.xpose.msra.mxu0 %v6175_v58  ;;  %4276 = vmatpush3.xpose.msra.mxu1 %v6190_v5 }
 0x1d2   :  { %4239 = vmatprep.subr.mxu0 %v6200_v9  ;;  %4277 = vmatprep.subr.mxu1 %v6239_v3 }
 0x1d5   :  { %4240 = vmatpush3.xpose.msra.mxu0 %v6209_v42  ;;  %4278 = vmatpush3.xpose.msra.mxu1 %v6203_v2 }
 0x1d6   :  { %4241 = vmatprep.subr.mxu0 %v6226_v48  ;;  %4279 = vmatprep.subr.mxu1 %v6251_v43 }
 0x1d9   :  { %4242 = vmatpush3.xpose.msra.mxu0 %v6229_v16  ;;  %4280 = vmatpush3.xpose.msra.mxu1 %v6219_v24 }
 0x1da   :  { %4243 = vmatprep.subr.mxu0 %v6254_v39  ;;  %4281 = vmatprep.subr.mxu1 %v6302_v21 }
 0x1dd   :  { %4244 = vmatpush3.xpose.msra.mxu0 %v6242_v13  ;;  %4282 = vmatpush3.xpose.msra.mxu1 %v6285_v12 }
 0x1de   :  { %4245 = vmatprep.subr.mxu0 %v6268_v14  ;;  %4283 = vmatprep.subr.mxu1 %v6323_v57 }
 0x1e1   :  { %4246 = vmatpush3.xpose.msra.mxu0 %v6258_v6  ;;  %4284 = vmatpush3.xpose.msra.mxu1 %v6308_v34 }
 0x1e2   :  { %4247 = vmatprep.subr.mxu0 %v6305_v53  ;;  %4285 = vmatprep.subr.mxu1 %v6351_v11 }
 0x1e5   :  { %4248 = vmatpush3.xpose.msra.mxu0 %v7915_v52  ;;  %4286 = vmatpush3.xpose.msra.mxu1 %v7916_v44 }
 0x1e6   :  { %4249 = vmatprep.subr.mxu0 %v7917_v18  ;;  %4287 = vmatprep.subr.mxu1 %v7918_v4 }
 0x1e9   :  { %4250 = vmatpush3.xpose.msra.mxu0 %v7919_v28  ;;  %4288 = vmatpush3.xpose.msra.mxu1 %v7920_v7 }
 0x1ea   :  { %4251 = vmatprep.subr.mxu0 %v7921_v36  ;;  %4289 = vmatprep.subr.mxu1 %v7922_v40 }
 0x1ed   :  { %4252 = vmatpush3.xpose.msra.mxu0 %v7923_v26  ;;  %4290 = vmatpush3.xpose.msra.mxu1 %v7924_v10 }
 0x1ee   :  { %4253 = vmatprep.subr.mxu0 %v7925_v1  ;;  %4291 = vmatprep.subr.mxu1 %v7926_v49 }
 0x1f1   :  { %4254 = vmatpush3.xpose.msra.mxu0 %v7927_v22  ;;  %4292 = vmatpush3.xpose.msra.mxu1 %v7928_v30 }
 0x1f2   :  { %4255 = vmatprep.subr.mxu0 %v7929_v46  ;;  %4293 = vmatprep.subr.mxu1 %v7930_v61 }
 0x1f5   :  { %4256 = vmatpush3.xpose.msra.mxu0 %v7931_v55  ;;  %4294 = vmatpush3.xpose.msra.mxu1 %v7932_v31 }
 0x1f6   :  { %4257 = vmatprep.subr.mxu0 %v7933_v51  ;;  %4295 = vmatprep.subr.mxu1 %v7934_v0 }
 0x1f9   :  { %4258 = vmatpush3.xpose.msra.mxu0 %v7935_v27  ;;  %4296 = vmatpush3.xpose.msra.mxu1 %v7936_v25  ;;  %v7944_v25 = vld [vmem:[#allocation32_spill] sm:$0xff] }
 0x1fa   :  { %4259 = vmatprep.subr.mxu0 %v7937_v63  ;;  %4297 = vmatprep.subr.mxu1 %v7938_v60  ;;  %v7945_v60 = vld [vmem:[#allocation37_spill] sm:$0xff] }
 0x1fd   :  { %4260 = vmatpush3.xpose.msra.mxu0 %v7939_v45  ;;  %4298 = vmatpush3.xpose.msra.mxu1 %v7940_v19  ;;  %v7946_v19 = vld [vmem:[#allocation7_spill] sm:$0xff] }
 0x1fe   :  { %4261 = vmatprep.subr.mxu0 %v7941_v33  ;;  %4335 = vmatprep.subr.mxu1 %v7942_v35  ;;  %v7947_v33 = vand.u32 4294901760, %v7946_v19  ;;  %v7948_v35 = vand.u32 4294901760, %v6119_v59  ;;  %v7952_v59 = vand.u32 4294901760, %v6175_v58  ;;  %v7959_v58 = vand.u32 4294901760, %v6268_v14 }
 0x200   :  { %4300 = vmatmul.mubr.f32.vlgmr.msra.gmra.mxu1 %v6555_v20 }
 0x201   :  { %4262 = vmatpush3.xpose.msra.mxu0 %v7943_v37  ;;  %4336 = vmatpush3.xpose.msra.mxu1 %v6096_v38  ;;  %v7949_v38 = vand.u32 4294901760, %v6136_v62  ;;  %v7954_v62 = vand.u32 4294901760, %v6209_v42  ;;  %v4608_v42 = vld [vmem:[%s7364_s1 + $0x1f8] sm:$0xff] }
 0x202   :  { %4367 = vmatprep.mubr.f32.mxu1 %v6546_v41  ;;  %4263 = vmatprep.subr.mxu0 %v7944_v25 }
 0x203   :  { %4337 = vmatprep.subr.mxu1 %v6127_v54  ;;  %v7951_v54 = vand.u32 4294901760, %v6164_v17  ;;  %v7958_v17 = vand.u32 4294901760, %v6242_v13 }
 0x205   :  { %4264 = vmatpush3.xpose.msra.mxu0 %v7945_v60  ;;  %4338 = vmatpush3.xpose.msra.mxu1 %v6112_v8  ;;  %v7950_v8 = vand.u32 4294901760, %v6147_v23  ;;  %v7955_v23 = vand.u32 4294901760, %v6226_v48  ;;  %v7965_v48 = vand.u32 4294901760, %v7921_v36 }
 0x206   :  { %4301 = vmatprep.subr.mxu0 %v7947_v33  ;;  %4339 = vmatprep.subr.mxu1 %v6155_v47  ;;  %v7956_v47 = vand.u32 4294901760, %v6229_v16  ;;  %v4609_v16 = vld [vmem:[%s7364_s1 + $0x178] sm:$0xff]  ;;  %v7971_v33 = vand.u32 4294901760, %v7933_v51 }
 0x208   :  { %4266 = vmatmul.mubr.f32.vlgmr.msra.gmra.mxu0 %v6549_v32 }
 0x209   :  { %4302 = vmatpush3.xpose.msra.mxu0 %v7948_v35  ;;  %4333 = vmatprep.mubr.f32.mxu0 %v6546_v41 }
 0x20a   :  { %4340 = vmatpush3.xpose.msra.mxu1 %v6130_v29  ;;  %4303 = vmatprep.subr.mxu0 %v7949_v38  ;;  %v7953_v29 = vand.u32 4294901760, %v6200_v9  ;;  %v7962_v9 = vand.u32 4294901760, %v7915_v52 }
 0x20b   :  { %4341 = vmatprep.subr.mxu1 %v6187_v15  ;;  %v7960_v15 = vand.u32 4294901760, %v6258_v6  ;;  %v7966_v6 = vand.u32 4294901760, %v7923_v26 }
 0x20d   :  { %4304 = vmatpush3.xpose.msra.mxu0 %v7950_v8 }
 0x20e   :  { %4342 = vmatpush3.xpose.msra.mxu1 %v6158_v56  ;;  %4305 = vmatprep.subr.mxu0 %v7951_v54  ;;  %v7957_v56 = vand.u32 4294901760, %v6254_v39 }
 0x20f   :  { %4343 = vmatprep.subr.mxu1 %v6217_v50  ;;  %v2011_v50 = vsel %vm1817_vm0, %v4608_v42, 0 }
 0x210   :  { %v6699_v13 = vand.u32 4294901760, %v2011_v50 }
 0x211   :  { %4306 = vmatpush3.xpose.msra.mxu0 %v7952_v59 }
 0x212   :  { %4344 = vmatpush3.xpose.msra.mxu1 %v6190_v5  ;;  %4307 = vmatprep.subr.mxu0 %v7953_v29  ;;  %v7961_v5 = vand.u32 4294901760, %v6305_v53  ;;  %v7967_v53 = vand.u32 4294901760, %v7925_v1  ;;  %v4614_v1 = vld [vmem:[%s7364_s1 + $0x1e0] sm:$0xff]  ;;  %v7972_v29 = vand.u32 4294901760, %v7935_v27 }
 0x213   :  { %4345 = vmatprep.subr.mxu1 %v6239_v3  ;;  %v1963_v3 = vsel %vm1817_vm0, %v4609_v16, 0 }
 0x214   :  { %v6707_v14 = vand.u32 4294901760, %v1963_v3 }
 0x215   :  { %4308 = vmatpush3.xpose.msra.mxu0 %v7954_v62 }
 0x216   :  { %4346 = vmatpush3.xpose.msra.mxu1 %v6203_v2  ;;  %4309 = vmatprep.subr.mxu0 %v7955_v23  ;;  %v7963_v2 = vand.u32 4294901760, %v7917_v18  ;;  %v7968_v18 = vand.u32 4294901760, %v7927_v22  ;;  %v6738_v36 = vsub.f32 %v1963_v3, %v6707_v14  ;;  %v4617_v23 = vld [vmem:[%s7364_s1 + $0x158] sm:$0xff]  ;;  %v7976_v3 = vand.u32 4294901760, %v7939_v45 }
 0x217   :  { %4347 = vmatprep.subr.mxu1 %v6251_v43  ;;  %v4610_v43 = vld [vmem:[%s7364_s1 + $0x1f0] sm:$0xff] }
 0x218   :  { %v2008_v39 = vsel %vm1817_vm0, %v4610_v43, 0  ;;  %v7619_v35 = vand.u32 4294901760, %v6738_v36 }
 0x219   :  { %4310 = vmatpush3.xpose.msra.mxu0 %v7956_v47  ;;  %v1951_v47 = vsel %vm1817_vm0, %v4617_v23, 0 }
 0x21a   :  { %4348 = vmatpush3.xpose.msra.mxu1 %v6219_v24  ;;  %4311 = vmatprep.subr.mxu0 %v7957_v56  ;;  %v7964_v24 = vand.u32 4294901760, %v7919_v28  ;;  %v7973_v56 = vld [vmem:[#allocation27_spill] sm:$0xff]  ;;  %v2980_v27 = vsub.f32 %v6738_v36, %v7619_v35 }
 0x21b   :  { %4349 = vmatprep.subr.mxu1 %v6302_v21 }
 0x21d   :  { %4312 = vmatpush3.xpose.msra.mxu0 %v7958_v17  ;;  %v7974_v17 = vand.u32 4294901760, %v7937_v63  ;;  %v4618_v63 = vld [vmem:[%s7364_s1 + $0x1d0] sm:$0xff] }
 0x21e   :  { %4350 = vmatpush3.xpose.msra.mxu1 %v6285_v12  ;;  %4313 = vmatprep.subr.mxu0 %v7959_v58  ;;  %v4611_v12 = vld [vmem:[%s7364_s1 + $0x170] sm:$0xff] }
 0x21f   :  { %4351 = vmatprep.subr.mxu1 %v6323_v57  ;;  %v1960_v21 = vsel %vm1817_vm0, %v4611_v12, 0  ;;  %v6720_v57 = vsub.f32 %v2011_v50, %v6699_v13  ;;  %v1996_v50 = vsel %vm1817_vm0, %v4618_v63, 0  ;;  %v7978_v12 = vld [vmem:[#allocation35_spill] sm:$0xff]  ;;  %v7984_v63 = vand.u32 4294901760, %v7945_v60 }
 0x221   :  { %4314 = vmatpush3.xpose.msra.mxu0 %v7960_v15 }
 0x222   :  { %4352 = vmatpush3.xpose.msra.mxu1 %v6308_v34  ;;  %4315 = vmatprep.subr.mxu0 %v7961_v5  ;;  %v6716_v34 = vand.u32 4294901760, %v2008_v39  ;;  %v7975_v5 = vld [vmem:[#allocation19_spill] sm:$0xff] }
 0x223   :  { %4353 = vmatprep.subr.mxu1 %v6351_v11  ;;  %v4612_v11 = vld [vmem:[%s7364_s1 + $0x1e8] sm:$0xff] }
 0x224   :  { %v2005_v52 = vsel %vm1817_vm0, %v4612_v11, 0 }
 0x225   :  { %4316 = vmatpush3.xpose.msra.mxu0 %v7962_v9  ;;  %v6743_v26 = vand.u32 4294901760, %v2005_v52 }
 0x226   :  { %4354 = vmatpush3.xpose.msra.mxu1 %v7916_v44  ;;  %4317 = vmatprep.subr.mxu0 %v7963_v2  ;;  %v6726_v44 = vand.u32 4294901760, %v1960_v21 }
 0x227   :  { %4355 = vmatprep.subr.mxu1 %v7918_v4  ;;  %v4613_v4 = vld [vmem:[%s7364_s1 + $0x168] sm:$0xff] }
 0x228   :  { %v1957_v28 = vsel %vm1817_vm0, %v4613_v4, 0 }
 0x229   :  { %4318 = vmatpush3.xpose.msra.mxu0 %v7964_v24  ;;  %v6751_v22 = vand.u32 4294901760, %v1957_v28  ;;  %v6812_v24 = vand.u32 4294901760, %v1951_v47 }
 0x22a   :  { %4356 = vmatpush3.xpose.msra.mxu1 %v7920_v7  ;;  %4319 = vmatprep.subr.mxu0 %v7965_v48  ;;  %v7969_v7 = vand.u32 4294901760, %v7929_v46  ;;  %v6756_v46 = vsub.f32 %v1960_v21, %v6726_v44  ;;  %v4619_v48 = vld [vmem:[%s7364_s1 + $0x150] sm:$0xff]  ;;  %v7979_v21 = vand.u32 4294901760, %v7978_v12 }
 0x22b   :  { %4357 = vmatprep.subr.mxu1 %v7922_v40  ;;  %v6741_v40 = vsub.f32 %v2008_v39, %v6716_v34  ;;  %v1948_v16 = vsel %vm1817_vm0, %v4619_v48, 0 }
 0x22c   :  { %v7617_v62 = vand.u32 4294901760, %v6756_v46 }
 0x22d   :  { %4320 = vmatpush3.xpose.msra.mxu0 %v7966_v6  ;;  %v7618_v38 = vand.u32 4294901760, %v6741_v40  ;;  %v7977_v6 = vld [vmem:[#allocation36_spill] sm:$0xff] }
 0x22e   :  { %4358 = vmatpush3.xpose.msra.mxu1 %v7924_v10  ;;  %4321 = vmatprep.subr.mxu0 %v7967_v53  ;;  %v7621_v10 = vand.u32 4294901760, %v6720_v57  ;;  %v2987_v43 = vsub.f32 %v6756_v46, %v7617_v62  ;;  %v2981_v53 = vand.u32 4294901760, %v2980_v27 }
 0x22f   :  { %4359 = vmatprep.subr.mxu1 %v7926_v49  ;;  %v2002_v49 = vsel %vm1817_vm0, %v4614_v1, 0  ;;  %v3099_v58 = vsub.f32 %v6741_v40, %v7618_v38 }
 0x230   :  { %v3092_v8 = vsub.f32 %v6720_v57, %v7621_v10  ;;  %v6774_v54 = vand.u32 4294901760, %v2002_v49 }
 0x231   :  { %4322 = vmatpush3.xpose.msra.mxu0 %v7968_v18  ;;  %v3100_v11 = vand.u32 4294901760, %v3099_v58 }
 0x232   :  { %4360 = vmatpush3.xpose.msra.mxu1 %v7928_v30  ;;  %4323 = vmatprep.subr.mxu0 %v7969_v7  ;;  %v7970_v30 = vand.u32 4294901760, %v7931_v55  ;;  %v6768_v55 = vsub.f32 %v2005_v52, %v6743_v26  ;;  %v3093_v9 = vand.u32 4294901760, %v3092_v8  ;;  %v6804_v2 = vsub.f32 %v2002_v49, %v6774_v54  ;;  %v4620_v7 = vld [vmem:[%s7364_s1 + $0x1c8] sm:$0xff] }
 0x233   :  { %4361 = vmatprep.subr.mxu1 %v7930_v61  ;;  %v4615_v61 = vld [vmem:[%s7364_s1 + $0x160] sm:$0xff]  ;;  %v1993_v1 = vsel %vm1817_vm0, %v4620_v7, 0  ;;  %v6843_v49 = vand.u32 4294901760, %v1948_v16  ;;  %v4625_v7 = vld [vmem:[%s7364_s1 + $0x138] sm:$0xff] }
 0x234   :  { %v1954_v19 = vsel %vm1817_vm0, %v4615_v61, 0  ;;  %v7616_v15 = vand.u32 4294901760, %v6768_v55  ;;  %v7612_v18 = vand.u32 4294901760, %v6804_v2  ;;  %v6860_v23 = vand.u32 4294901760, %v1993_v1 }
 0x235   :  { %4324 = vmatpush3.xpose.msra.mxu0 %v7970_v30  ;;  %v6780_v59 = vand.u32 4294901760, %v1954_v19  ;;  %v4621_v30 = vld [vmem:[%s7364_s1 + $0x148] sm:$0xff] }
 0x236   :  { %4362 = vmatpush3.xpose.msra.mxu1 %v7932_v31  ;;  %4325 = vmatprep.subr.mxu0 %v7971_v33  ;;  %v4616_v31 = vld [vmem:[%s7364_s1 + $0x1d8] sm:$0xff]  ;;  %v3106_v52 = vsub.f32 %v6768_v55, %v7616_v15  ;;  %v1945_v61 = vsel %vm1817_vm0, %v4621_v30, 0  ;;  %v2988_v33 = vand.u32 4294901760, %v2987_v43  ;;  %v7987_v30 = vld [vmem:[#allocation38_spill] sm:$0xff] }
 0x237   :  { %4363 = vmatprep.subr.mxu1 %v7934_v0  ;;  %v1999_v51 = vsel %vm1817_vm0, %v4616_v31, 0  ;;  %v6786_v0 = vsub.f32 %v1957_v28, %v6751_v22  ;;  %v6831_v45 = vsub.f32 %v1954_v19, %v6780_v59  ;;  %v6837_v28 = vand.u32 4294901760, %v1996_v50 }
 0x238   :  { %v6806_v42 = vand.u32 4294901760, %v1999_v51  ;;  %v7980_v19 = vand.u32 4294901760, %v7943_v37  ;;  %v3107_v31 = vand.u32 4294901760, %v3106_v52  ;;  %v3113_v37 = vsub.f32 %v6804_v2, %v7612_v18 }
 0x239   :  { %4326 = vmatpush3.xpose.msra.mxu0 %v7972_v29  ;;  %v7613_v39 = vand.u32 4294901760, %v6786_v0  ;;  %v6858_v29 = vsub.f32 %v1951_v47, %v6812_v24  ;;  %v6869_v27 = vsub.f32 %v1996_v50, %v6837_v28  ;;  %v4622_v47 = vld [vmem:[%s7364_s1 + $0x1c0] sm:$0xff]  ;;  %v6884_v50 = vsub.f32 %v1948_v16, %v6843_v49 }
 0x23a   :  { %4364 = vmatpush3.xpose.msra.mxu1 %v7973_v56  ;;  %4327 = vmatprep.subr.mxu0 %v7974_v17  ;;  %v6835_v4 = vsub.f32 %v1999_v51, %v6806_v42  ;;  %v7610_v51 = vand.u32 4294901760, %v6831_v45  ;;  %v7981_v56 = vand.u32 4294901760, %v7944_v25  ;;  %v1990_v58 = vsel %vm1817_vm0, %v4622_v47, 0  ;;  %v4623_v25 = vld [vmem:[%s7364_s1 + $0x140] sm:$0xff] }
 0x23b   :  { %4365 = vmatprep.subr.mxu1 %v7975_v5  ;;  %v2994_v8 = vsub.f32 %v6786_v0, %v7613_v39  ;;  %7982 = vst [vmem:[#allocation20_spill] sm:$0xff] %v6869_v27  ;;  %v6875_v5 = vand.u32 4294901760, %v1945_v61  ;;  %7985 = vst [vmem:[#allocation23_spill] sm:$0xff] %v6884_v50  ;;  %v7607_v43 = vand.u32 4294901760, %v6858_v29  ;;  %v6894_v12 = vand.u32 4294901760, %v1990_v58 }
 0x23c   :  { %v7608_v17 = vand.u32 4294901760, %v6835_v4  ;;  %v3114_v60 = vand.u32 4294901760, %v3113_v37 }
 0x23d   :  { %4328 = vmatpush3.xpose.msra.mxu0 %v7976_v3  ;;  %7983 = vst [vmem:[#allocation8_spill] sm:$0xff] %v6875_v5  ;;  %v2995_v48 = vand.u32 4294901760, %v2994_v8  ;;  %v3001_v3 = vsub.f32 %v6831_v45, %v7610_v51  ;;  %v6923_v37 = vsub.f32 %v1990_v58, %v6894_v12  ;;  %v4627_v58 = vld [vmem:[%s7364_s1 + $0x130] sm:$0xff] }
 0x23e   :  { %4366 = vmatpush3.xpose.msra.mxu1 %v7977_v6  ;;  %4329 = vmatprep.subr.mxu0 %v7979_v21  ;;  %v6892_v6 = vsub.f32 %v1993_v1, %v6860_v23  ;;  %v3120_v16 = vsub.f32 %v6835_v4, %v7608_v17  ;;  %v7606_v21 = vand.u32 4294901760, %v6869_v27  ;;  %v1939_v1 = vsel %vm1817_vm0, %v4625_v7, 0 }
 0x23f   :  { %4403 = vmatprep.subr.mxu1 %v3093_v9  ;;  %v1942_v9 = vsel %vm1817_vm0, %v4623_v25, 0  ;;  %v3002_v8 = vand.u32 4294901760, %v3001_v3  ;;  %7989 = vst [vmem:[#allocation10_spill] sm:$0xff] %v6923_v37  ;;  %v6934_v3 = vand.u32 4294901760, %v1939_v1 }
 0x240   :  { %7986 = vst [vmem:[#allocation11_spill] sm:$0xff] %v6892_v6  ;;  %v6905_v52 = vand.u32 4294901760, %v1942_v9  ;;  %v3121_v47 = vand.u32 4294901760, %v3120_v16 }
 0x241   :  { %4368 = vmatmul.mubr.f32.vlgmr.msra.gmra.mxu1 %v6546_v41  ;;  %4330 = vmatpush3.xpose.msra.mxu0 %v7980_v19  ;;  %v7609_v19 = vand.u32 4294901760, %v6884_v50  ;;  %v6978_v39 = vsub.f32 %v1939_v1, %v6934_v3  ;;  %v4631_v1 = vld [vmem:[%s7364_s1 + $0x120] sm:$0xff] }
 0x242   :  { %4404 = vmatpush3.xpose.msra.mxu1 %v2981_v53  ;;  %4435 = vmatprep.mubr.f32.mxu1 %v6546_v41  ;;  %v4624_v53 = vld [vmem:[%s7364_s1 + $0x1b8] sm:$0xff] }
 0x243   :  { %4331 = vmatprep.subr.mxu0 %v7981_v56  ;;  %4405 = vmatprep.subr.mxu1 %v3100_v11  ;;  %v1987_v11 = vsel %vm1817_vm0, %v4624_v53, 0  ;;  %v7611_v56 = vand.u32 4294901760, %v6892_v6  ;;  %v3015_v16 = vsub.f32 %v6884_v50, %v7609_v19  ;;  %7993 = vst [vmem:[#allocation12_spill] sm:$0xff] %v6978_v39 }
 0x244   :  { %v6928_v25 = vand.u32 4294901760, %v1987_v11 }
 0x245   :  { %4332 = vmatpush3.xpose.msra.mxu0 %v7984_v63  ;;  %v4626_v63 = vld [vmem:[%s7364_s1 + $0x1b0] sm:$0xff] }
 0x246   :  { %4406 = vmatpush3.xpose.msra.mxu1 %v2988_v33  ;;  %4369 = vmatprep.subr.mxu0 %v6699_v13  ;;  %v6915_v33 = vsub.f32 %v1945_v61, %v6875_v5  ;;  %v3127_v61 = vsub.f32 %v6869_v27, %v7606_v21  ;;  %7990 = vst [vmem:[#allocation9_spill] sm:$0xff] %v6928_v25  ;;  %v7615_v21 = vand.u32 4294901760, %v6923_v37 }
 0x247   :  { %4407 = vmatprep.subr.mxu1 %v3107_v31  ;;  %v3008_v31 = vsub.f32 %v6858_v29, %v7607_v43  ;;  %v6954_v17 = vsub.f32 %v1987_v11, %v6928_v25  ;;  %v3016_v11 = vand.u32 4294901760, %v3015_v16 }
 0x248   :  { %4334 = vmatmul.mubr.f32.vlgmr.msra.gmra.mxu0 %v6546_v41  ;;  %7988 = vst [vmem:[#allocation28_spill] sm:$0xff] %v6915_v33  ;;  %v7614_v53 = vand.u32 4294901760, %v6915_v33  ;;  %v3128_v43 = vand.u32 4294901760, %v3127_v61 }
 0x249   :  { %4370 = vmatpush3.xpose.msra.mxu0 %v6707_v14  ;;  %4401 = vmatprep.mubr.f32.mxu0 %v7987_v30  ;;  %v3009_v7 = vand.u32 4294901760, %v3008_v31  ;;  %7992 = vst [vmem:[#allocation17_spill] sm:$0xff] %v6954_v17  ;;  %v7622_v16 = vand.u32 4294901760, %v6954_v17 }
 0x24a   :  { %4408 = vmatpush3.xpose.msra.mxu1 %v2995_v48  ;;  %4371 = vmatprep.subr.mxu0 %v6716_v34  ;;  %v1984_v48 = vsel %vm1817_vm0, %v4626_v63, 0  ;;  %v3134_v63 = vsub.f32 %v6892_v6, %v7611_v56  ;;  %v3022_v61 = vsub.f32 %v6915_v33, %v7614_v53 }
 0x24b   :  { %4409 = vmatprep.subr.mxu1 %v3114_v60  ;;  %v1936_v60 = vsel %vm1817_vm0, %v4627_v58, 0  ;;  %v6951_v58 = vsub.f32 %v1942_v9, %v6905_v52  ;;  %v6956_v19 = vand.u32 4294901760, %v1984_v48  ;;  %v4629_v9 = vld [vmem:[%s7364_s1 + $0x128] sm:$0xff] }
 0x24c   :  { %v6962_v51 = vand.u32 4294901760, %v1936_v60  ;;  %v3135_v56 = vand.u32 4294901760, %v3134_v63 }
 0x24d   :  { %4372 = vmatpush3.xpose.msra.mxu0 %v6726_v44  ;;  %7991 = vst [vmem:[#allocation14_spill] sm:$0xff] %v6951_v58  ;;  %v7620_v18 = vand.u32 4294901760, %v6951_v58 }
 0x24e   :  { %4410 = vmatpush3.xpose.msra.mxu1 %v3002_v8  ;;  %4373 = vmatprep.subr.mxu0 %v6743_v26  ;;  %v4628_v8 = vld [vmem:[%s7364_s1 + $0x1a8] sm:$0xff]  ;;  %v7003_v62 = vsub.f32 %v1936_v60, %v6962_v51 }
 0x24f   :  { %4411 = vmatprep.subr.mxu1 %v3121_v47  ;;  %v1981_v31 = vsel %vm1817_vm0, %v4628_v8, 0  ;;  %v1933_v47 = vsel %vm1817_vm0, %v4629_v9, 0  ;;  %v3141_v8 = vsub.f32 %v6923_v37, %v7615_v21  ;;  %v6982_v9 = vsub.f32 %v1984_v48, %v6956_v19 }
 0x250   :  { %v6984_v53 = vand.u32 4294901760, %v1981_v31  ;;  %v6990_v21 = vand.u32 4294901760, %v1933_v47  ;;  %v3023_v48 = vand.u32 4294901760, %v3022_v61  ;;  %v3029_v15 = vsub.f32 %v6951_v58, %v7620_v18  ;;  %7997 = vst [vmem:[#allocation6_spill] sm:$0xff] %v7003_v62  ;;  %v4632_v18 = vld [vmem:[%s7364_s1 + $0x198] sm:$0xff] }
 0x251   :  { %4374 = vmatpush3.xpose.msra.mxu0 %v6751_v22  ;;  %7994 = vst [vmem:[#allocation13_spill] sm:$0xff] %v6982_v9  ;;  %v3142_v35 = vand.u32 4294901760, %v3141_v8  ;;  %v3148_v61 = vsub.f32 %v6954_v17, %v7622_v16  ;;  %v1975_v60 = vsel %vm1817_vm0, %v4632_v18, 0  ;;  %v8002_v58 = vand.u32 4294901760, %v6982_v9 }
 0x252   :  { %4412 = vmatpush3.xpose.msra.mxu1 %v3009_v7  ;;  %4375 = vmatprep.subr.mxu0 %v6774_v54  ;;  %7995 = vst [vmem:[#allocation25_spill] sm:$0xff] %v6984_v53  ;;  %v4630_v7 = vld [vmem:[%s7364_s1 + $0x1a0] sm:$0xff]  ;;  %7996 = vst [vmem:[#allocation15_spill] sm:$0xff] %v6990_v21  ;;  %v7026_v16 = vsub.f32 %v1933_v47, %v6990_v21  ;;  %v7040_v37 = vand.u32 4294901760, %v1975_v60 }
 0x253   :  { %4413 = vmatprep.subr.mxu1 %v3128_v43  ;;  %v1978_v63 = vsel %vm1817_vm0, %v4630_v7, 0  ;;  %v1930_v43 = vsel %vm1817_vm0, %v4631_v1, 0  ;;  %v7629_v7 = vand.u32 4294901760, %v6978_v39  ;;  %v7012_v1 = vsub.f32 %v1981_v31, %v6984_v53 }
 0x254   :  { %v7005_v38 = vand.u32 4294901760, %v1978_v63  ;;  %v7018_v10 = vand.u32 4294901760, %v1930_v43  ;;  %8000 = vst [vmem:[#allocation24_spill] sm:$0xff] %v7026_v16  ;;  %v3030_v31 = vand.u32 4294901760, %v3029_v15  ;;  %v3155_v47 = vsub.f32 %v6982_v9, %v8002_v58  ;;  %v4634_v15 = vld [vmem:[%s7364_s1 + $0x190] sm:$0xff] }
 0x255   :  { %4376 = vmatpush3.xpose.msra.mxu0 %v6780_v59  ;;  %7999 = vst [vmem:[#allocation30_spill] sm:$0xff] %v7012_v1  ;;  %v3036_v18 = vsub.f32 %v6978_v39, %v7629_v7  ;;  %v1972_v7 = vsel %vm1817_vm0, %v4634_v15, 0 }
 0x256   :  { %4414 = vmatpush3.xpose.msra.mxu1 %v3016_v11  ;;  %4377 = vmatprep.subr.mxu0 %v6806_v42  ;;  %7998 = vst [vmem:[#allocation21_spill] sm:$0xff] %v7005_v38  ;;  %v7034_v17 = vsub.f32 %v1978_v63, %v7005_v38  ;;  %v7060_v39 = vsub.f32 %v1930_v43, %v7018_v10  ;;  %v3156_v33 = vand.u32 4294901760, %v3155_v47  ;;  %v7068_v58 = vand.u32 4294901760, %v1972_v7  ;;  %v4637_v43 = vld [vmem:[%s7364_s1 + $0x108] sm:$0xff] }
 0x257   :  { %4415 = vmatprep.subr.mxu1 %v3135_v56  ;;  %v4633_v56 = vld [vmem:[%s7364_s1 + $0x118] sm:$0xff] }
 0x258   :  { %v1927_v8 = vsel %vm1817_vm0, %v4633_v56, 0  ;;  %8001 = vst [vmem:[#allocation16_spill] sm:$0xff] %v7034_v17  ;;  %v3149_v56 = vand.u32 4294901760, %v3148_v61  ;;  %v3037_v61 = vand.u32 4294901760, %v3036_v18  ;;  %8004 = vst [vmem:[#allocation26_spill] sm:$0xff] %v7060_v39  ;;  %v4636_v18 = vld [vmem:[%s7364_s1 + $0x188] sm:$0xff] }
 0x259   :  { %4378 = vmatpush3.xpose.msra.mxu0 %v6812_v24  ;;  %v7046_v11 = vand.u32 4294901760, %v1927_v8 }
 0x25a   :  { %4416 = vmatpush3.xpose.msra.mxu1 %v3023_v48  ;;  %4379 = vmatprep.subr.mxu0 %v6837_v28  ;;  %v8003_v48 = vand.u32 4294901760, %v7003_v62 }
 0x25b   :  { %4417 = vmatprep.subr.mxu1 %v3142_v35  ;;  %v4635_v35 = vld [vmem:[%s7364_s1 + $0x110] sm:$0xff]  ;;  %v7090_v50 = vsub.f32 %v1927_v8, %v7046_v11 }
 0x25c   :  { %v1924_v63 = vsel %vm1817_vm0, %v4635_v35, 0  ;;  %v3043_v15 = vsub.f32 %v7003_v62, %v8003_v48  ;;  %v8005_v35 = vand.u32 4294901760, %v7012_v1  ;;  %v1969_v48 = vsel %vm1817_vm0, %v4636_v18, 0 }
 0x25d   :  { %4380 = vmatpush3.xpose.msra.mxu0 %v6843_v49  ;;  %v7074_v9 = vand.u32 4294901760, %v1924_v63  ;;  %v8008_v18 = vand.u32 4294901760, %v7034_v17  ;;  %v7654_v62 = vand.u32 4294901760, %v7060_v39 }
 0x25e   :  { %4418 = vmatpush3.xpose.msra.mxu1 %v3030_v31  ;;  %4381 = vmatprep.subr.mxu0 %v6860_v23  ;;  %v3162_v6 = vsub.f32 %v7012_v1, %v8005_v35  ;;  %v7066_v31 = vsub.f32 %v1975_v60, %v7040_v37  ;;  %v8007_v60 = vand.u32 4294901760, %v7026_v16  ;;  %v3044_v35 = vand.u32 4294901760, %v3043_v15  ;;  %v4638_v15 = vld [vmem:[%s7364_s1 + $0x180] sm:$0xff] }
 0x25f   :  { %4419 = vmatprep.subr.mxu1 %v3149_v56  ;;  %v1921_v56 = vsel %vm1817_vm0, %v4637_v43, 0  ;;  %v3169_v1 = vsub.f32 %v7034_v17, %v8008_v18  ;;  %v3057_v27 = vsub.f32 %v7060_v39, %v7654_v62  ;;  %v7115_v17 = vsub.f32 %v1924_v63, %v7074_v9 }
 0x260   :  { %8006 = vst [vmem:[#allocation18_spill] sm:$0xff] %v7066_v31  ;;  %v3050_v47 = vsub.f32 %v7026_v16, %v8007_v60  ;;  %v3163_v43 = vand.u32 4294901760, %v3162_v6  ;;  %v1966_v60 = vsel %vm1817_vm0, %v4638_v15, 0  ;;  %v7102_v18 = vand.u32 4294901760, %v1921_v56 }
 0x261   :  { %4382 = vmatpush3.xpose.msra.mxu0 %v6875_v5  ;;  %v7094_v5 = vsub.f32 %v1972_v7, %v7068_v58  ;;  %v3170_v8 = vand.u32 4294901760, %v3169_v1  ;;  %v7665_v15 = vand.u32 4294901760, %v7090_v50  ;;  %v8009_v16 = vand.u32 4294901760, %v7066_v31 }
 0x262   :  { %4420 = vmatpush3.xpose.msra.mxu1 %v3037_v61  ;;  %4383 = vmatprep.subr.mxu0 %v6894_v12  ;;  %v7096_v61 = vand.u32 4294901760, %v1969_v48  ;;  %v3051_v7 = vand.u32 4294901760, %v3050_v47  ;;  %v7124_v1 = vand.u32 4294901760, %v1966_v60  ;;  %v3058_v63 = vand.u32 4294901760, %v3057_v27 }
 0x263   :  { %4421 = vmatprep.subr.mxu1 %v3156_v33  ;;  %v4639_v33 = vld [vmem:[%s7364_s1 + $0x100] sm:$0xff]  ;;  %v7659_v47 = vand.u32 4294901760, %v7094_v5  ;;  %v7135_v62 = vsub.f32 %v1921_v56, %v7102_v18 }
 0x264   :  { %v1918_v6 = vsel %vm1817_vm0, %v4639_v33, 0  ;;  %v3176_v33 = vsub.f32 %v7066_v31, %v8009_v16  ;;  %v7660_v16 = vand.u32 4294901760, %v7115_v17  ;;  %v7142_v39 = vsub.f32 %v1966_v60, %v7124_v1 }
 0x265   :  { %4384 = vmatpush3.xpose.msra.mxu0 %v6905_v52  ;;  %v3183_v31 = vsub.f32 %v7094_v5, %v7659_v47 }
 0x266   :  { %4422 = vmatpush3.xpose.msra.mxu1 %v3044_v35  ;;  %4385 = vmatprep.subr.mxu0 %v6928_v25  ;;  %v7122_v35 = vsub.f32 %v1969_v48, %v7096_v61  ;;  %v7126_v25 = vand.u32 4294901760, %v1918_v6  ;;  %v3177_v48 = vand.u32 4294901760, %v3176_v33  ;;  %v3071_v56 = vsub.f32 %v7115_v17, %v7660_v16 }
 0x267   :  { %4423 = vmatprep.subr.mxu1 %v3163_v43  ;;  %v3064_v43 = vsub.f32 %v7090_v50, %v7665_v15  ;;  %v3184_v47 = vand.u32 4294901760, %v3183_v31  ;;  %v8024_v15 = vld [vmem:[#allocation24_spill] sm:$0xff] }
 0x268   :  { %8010 = vst [vmem:[#allocation29_spill] sm:$0xff] %v7122_v35  ;;  %v7151_v33 = vsub.f32 %v1918_v6, %v7126_v25 }
 0x269   :  { %4386 = vmatpush3.xpose.msra.mxu0 %v6934_v3  ;;  %v3065_v27 = vand.u32 4294901760, %v3064_v43  ;;  %v3072_v43 = vand.u32 4294901760, %v3071_v56 }
 0x26a   :  { %4424 = vmatpush3.xpose.msra.mxu1 %v3051_v7  ;;  %4387 = vmatprep.subr.mxu0 %v6956_v19  ;;  %v7664_v7 = vand.u32 4294901760, %v7122_v35  ;;  %v7662_v6 = vand.u32 4294901760, %v7151_v33 }
 0x26b   :  { %4425 = vmatprep.subr.mxu1 %v3170_v8  ;;  %v7661_v8 = vand.u32 4294901760, %v7135_v62 }
 0x26c   :  { %v3190_v60 = vsub.f32 %v7122_v35, %v7664_v7  ;;  %v3085_v56 = vsub.f32 %v7151_v33, %v7662_v6  ;;  %v8021_v6 = vld [vmem:[#allocation13_spill] sm:$0xff]  ;;  %v8023_v7 = vld [vmem:[#allocation30_spill] sm:$0xff] }
 0x26d   :  { %4388 = vmatpush3.xpose.msra.mxu0 %v6962_v51  ;;  %v3078_v16 = vsub.f32 %v7135_v62, %v7661_v8 }
 0x26e   :  { %4426 = vmatpush3.xpose.msra.mxu1 %v3058_v63  ;;  %4389 = vmatprep.subr.mxu0 %v6984_v53  ;;  %v7663_v63 = vand.u32 4294901760, %v7142_v39  ;;  %v3191_v31 = vand.u32 4294901760, %v3190_v60  ;;  %v8014_v60 = vld [vmem:[#allocation11_spill] sm:$0xff] }
 0x26f   :  { %4427 = vmatprep.subr.mxu1 %v3177_v48 }
 0x270   :  { %v3197_v48 = vsub.f32 %v7142_v39, %v7663_v63  ;;  %v8022_v63 = vld [vmem:[#allocation6_spill] sm:$0xff] }
 0x271   :  { %4390 = vmatpush3.xpose.msra.mxu0 %v6990_v21 }
 0x272   :  { %4428 = vmatpush3.xpose.msra.mxu1 %v3065_v27  ;;  %4391 = vmatprep.subr.mxu0 %v7005_v38  ;;  %v3079_v27 = vand.u32 4294901760, %v3078_v16  ;;  %v3198_v8 = vand.u32 4294901760, %v3197_v48  ;;  %v8012_v16 = vld [vmem:[#allocation20_spill] sm:$0xff]  ;;  %v8017_v48 = vld [vmem:[#allocation10_spill] sm:$0xff] }
 0x273   :  { %4429 = vmatprep.subr.mxu1 %v3184_v47  ;;  %v3086_v47 = vand.u32 4294901760, %v3085_v56  ;;  %v8019_v56 = vld [vmem:[#allocation17_spill] sm:$0xff] }
 0x275   :  { %4392 = vmatpush3.xpose.msra.mxu0 %v7018_v10 }
 0x276   :  { %4430 = vmatpush3.xpose.msra.mxu1 %v3072_v43  ;;  %4393 = vmatprep.subr.mxu0 %v7040_v37  ;;  %v8015_v43 = vld [vmem:[#allocation9_spill] sm:$0xff] }
 0x277   :  { %4431 = vmatprep.subr.mxu1 %v3191_v31  ;;  %v8016_v31 = vld [vmem:[#allocation28_spill] sm:$0xff] }
 0x279   :  { %4394 = vmatpush3.xpose.msra.mxu0 %v7046_v11 }
 0x27a   :  { %4432 = vmatpush3.xpose.msra.mxu1 %v3079_v27  ;;  %4395 = vmatprep.subr.mxu0 %v7068_v58  ;;  %v8018_v27 = vld [vmem:[#allocation14_spill] sm:$0xff] }
 0x27b   :  { %4433 = vmatprep.subr.mxu1 %v3198_v8  ;;  %v8013_v8 = vld [vmem:[#allocation23_spill] sm:$0xff] }
 0x27d   :  { %4396 = vmatpush3.xpose.msra.mxu0 %v7074_v9 }
 0x27e   :  { %4434 = vmatpush3.xpose.msra.mxu1 %v3086_v47  ;;  %4397 = vmatprep.subr.mxu0 %v7096_v61  ;;  %v8020_v47 = vld [vmem:[#allocation12_spill] sm:$0xff] }
 0x27f   :  { %4471 = vmatprep.subr.mxu1 %v6699_v13 }
 0x281   :  { %4436 = vmatmul.mubr.f32.vlgmr.msra.gmra.mxu1 %v6546_v41  ;;  %4398 = vmatpush3.xpose.msra.mxu0 %v7102_v18 }
 0x282   :  { %4472 = vmatpush3.xpose.msra.mxu1 %v6707_v14  ;;  %4503 = vmatprep.mubr.f32.mxu1 %v6555_v20 }
 0x283   :  { %4399 = vmatprep.subr.mxu0 %v7124_v1  ;;  %4473 = vmatprep.subr.mxu1 %v6716_v34 }
 0x285   :  { %4400 = vmatpush3.xpose.msra.mxu0 %v7126_v25 }
 0x286   :  { %4474 = vmatpush3.xpose.msra.mxu1 %v6726_v44  ;;  %4437 = vmatprep.subr.mxu0 %v6720_v57 }
 0x287   :  { %4475 = vmatprep.subr.mxu1 %v6743_v26 }
 0x288   :  { %4402 = vmatmul.mubr.f32.vlgmr.msra.gmra.mxu0 %v7987_v30  ;;  %v8011_v30 = vld [vmem:[#allocation8_spill] sm:$0xff] }
 0x289   :  { %4438 = vmatpush3.xpose.msra.mxu0 %v6738_v36  ;;  %4469 = vmatprep.mubr.f32.mxu0 %v6549_v32 }
 0x28a   :  { %4476 = vmatpush3.xpose.msra.mxu1 %v6751_v22  ;;  %4439 = vmatprep.subr.mxu0 %v6741_v40 }
 0x28b   :  { %4477 = vmatprep.subr.mxu1 %v6774_v54 }
 0x28d   :  { %4440 = vmatpush3.xpose.msra.mxu0 %v6756_v46 }
 0x28e   :  { %4478 = vmatpush3.xpose.msra.mxu1 %v6780_v59  ;;  %4441 = vmatprep.subr.mxu0 %v6768_v55 }
 0x28f   :  { %4479 = vmatprep.subr.mxu1 %v6806_v42 }
 0x291   :  { %4442 = vmatpush3.xpose.msra.mxu0 %v6786_v0 }
 0x292   :  { %4480 = vmatpush3.xpose.msra.mxu1 %v6812_v24  ;;  %4443 = vmatprep.subr.mxu0 %v6804_v2 }
 0x293   :  { %4481 = vmatprep.subr.mxu1 %v6837_v28 }
 0x295   :  { %4444 = vmatpush3.xpose.msra.mxu0 %v6831_v45 }
 0x296   :  { %4482 = vmatpush3.xpose.msra.mxu1 %v6843_v49  ;;  %4445 = vmatprep.subr.mxu0 %v6835_v4 }
 0x297   :  { %4483 = vmatprep.subr.mxu1 %v6860_v23 }
 0x299   :  { %4446 = vmatpush3.xpose.msra.mxu0 %v6858_v29 }
 0x29a   :  { %4484 = vmatpush3.xpose.msra.mxu1 %v8011_v30  ;;  %4447 = vmatprep.subr.mxu0 %v8012_v16 }
 0x29b   :  { %4485 = vmatprep.subr.mxu1 %v6894_v12 }
 0x29d   :  { %4448 = vmatpush3.xpose.msra.mxu0 %v8013_v8 }
 0x29e   :  { %4486 = vmatpush3.xpose.msra.mxu1 %v6905_v52  ;;  %4449 = vmatprep.subr.mxu0 %v8014_v60 }
 0x29f   :  { %4487 = vmatprep.subr.mxu1 %v8015_v43 }
 0x2a1   :  { %4450 = vmatpush3.xpose.msra.mxu0 %v8016_v31 }
 0x2a2   :  { %4488 = vmatpush3.xpose.msra.mxu1 %v6934_v3  ;;  %4451 = vmatprep.subr.mxu0 %v8017_v48 }
 0x2a3   :  { %4489 = vmatprep.subr.mxu1 %v6956_v19 }
 0x2a5   :  { %4452 = vmatpush3.xpose.msra.mxu0 %v8018_v27 }
 0x2a6   :  { %4490 = vmatpush3.xpose.msra.mxu1 %v6962_v51  ;;  %4453 = vmatprep.subr.mxu0 %v8019_v56 }
 0x2a7   :  { %4491 = vmatprep.subr.mxu1 %v6984_v53  ;;  %v8025_v53 = vld [vmem:[#allocation16_spill] sm:$0xff] }
 0x2a9   :  { %4454 = vmatpush3.xpose.msra.mxu0 %v8020_v47 }
 0x2aa   :  { %4492 = vmatpush3.xpose.msra.mxu1 %v6990_v21  ;;  %4455 = vmatprep.subr.mxu0 %v8021_v6  ;;  %v8026_v21 = vld [vmem:[#allocation26_spill] sm:$0xff] }
 0x2ab   :  { %4493 = vmatprep.subr.mxu1 %v7005_v38  ;;  %v8027_v38 = vld [vmem:[#allocation18_spill] sm:$0xff] }
 0x2ad   :  { %4456 = vmatpush3.xpose.msra.mxu0 %v8022_v63 }
 0x2ae   :  { %4494 = vmatpush3.xpose.msra.mxu1 %v7018_v10  ;;  %4457 = vmatprep.subr.mxu0 %v8023_v7 }
 0x2af   :  { %4495 = vmatprep.subr.mxu1 %v7040_v37 }
 0x2b1   :  { %4458 = vmatpush3.xpose.msra.mxu0 %v8024_v15 }
 0x2b2   :  { %4496 = vmatpush3.xpose.msra.mxu1 %v7046_v11  ;;  %4459 = vmatprep.subr.mxu0 %v8025_v53 }
 0x2b3   :  { %4497 = vmatprep.subr.mxu1 %v7068_v58 }
 0x2b5   :  { %4460 = vmatpush3.xpose.msra.mxu0 %v8026_v21 }
 0x2b6   :  { %4498 = vmatpush3.xpose.msra.mxu1 %v7074_v9  ;;  %4461 = vmatprep.subr.mxu0 %v8027_v38 }
 0x2b7   :  { %4499 = vmatprep.subr.mxu1 %v7096_v61 }
 0x2b9   :  { %4462 = vmatpush3.xpose.msra.mxu0 %v7090_v50 }
 0x2ba   :  { %4500 = vmatpush3.xpose.msra.mxu1 %v7102_v18  ;;  %4463 = vmatprep.subr.mxu0 %v7094_v5 }
 0x2bb   :  { %4501 = vmatprep.subr.mxu1 %v7124_v1 }
 0x2bd   :  { %4464 = vmatpush3.xpose.msra.mxu0 %v7115_v17 }
 0x2be   :  { %4502 = vmatpush3.xpose.msra.mxu1 %v7126_v25  ;;  %4465 = vmatprep.subr.mxu0 %v7122_v35  ;;  %v8028_v35 = vand.u32 4294901760, %v6720_v57  ;;  %v8034_v57 = vand.u32 4294901760, %v6804_v2  ;;  %v8045_v2 = vld [vmem:[#allocation25_spill] sm:$0xff] }
 0x2bf   :  { %4539 = vmatprep.subr.mxu1 %v6699_v13  ;;  %v8030_v13 = vand.u32 4294901760, %v6741_v40  ;;  %v8037_v40 = vand.u32 4294901760, %v6858_v29  ;;  %v8053_v29 = vand.u32 4294901760, %v8025_v53  ;;  %v8059_v53 = vld [vmem:[#allocation29_spill] sm:$0xff] }
 0x2c1   :  { %4504 = vmatmul.mubr.f32.vlgmr.msra.gmra.mxu1 %v6555_v20  ;;  %4466 = vmatpush3.xpose.msra.mxu0 %v7135_v62  ;;  %v8029_v20 = vand.u32 4294901760, %v6738_v36  ;;  %v8036_v36 = vand.u32 4294901760, %v6835_v4  ;;  %v8049_v4 = vld [vmem:[#allocation21_spill] sm:$0xff] }
 0x2c2   :  { %4540 = vmatpush3.xpose.msra.mxu1 %v6707_v14  ;;  %4571 = vmatprep.mubr.f32.mxu1 %v6546_v41  ;;  %v8031_v14 = vand.u32 4294901760, %v6756_v46  ;;  %v8040_v46 = vand.u32 4294901760, %v8014_v60 }
 0x2c3   :  { %4467 = vmatprep.subr.mxu0 %v7142_v39  ;;  %4541 = vmatprep.subr.mxu1 %v6716_v34  ;;  %v8032_v34 = vand.u32 4294901760, %v6768_v55  ;;  %v8041_v55 = vand.u32 4294901760, %v8016_v31 }
 0x2c5   :  { %4468 = vmatpush3.xpose.msra.mxu0 %v7151_v33 }
 0x2c6   :  { %4542 = vmatpush3.xpose.msra.mxu1 %v6726_v44  ;;  %4505 = vmatprep.subr.mxu0 %v8028_v35  ;;  %v8035_v44 = vand.u32 4294901760, %v6831_v45  ;;  %v8048_v45 = vand.u32 4294901760, %v8021_v6 }
 0x2c7   :  { %4543 = vmatprep.subr.mxu1 %v6743_v26  ;;  %v8038_v26 = vand.u32 4294901760, %v8012_v16 }
 0x2c8   :  { %4470 = vmatmul.mubr.f32.vlgmr.msra.gmra.mxu0 %v6549_v32  ;;  %v8033_v32 = vand.u32 4294901760, %v6786_v0  ;;  %v8044_v0 = vand.u32 4294901760, %v8019_v56 }
 0x2c9   :  { %4506 = vmatpush3.xpose.msra.mxu0 %v8029_v20  ;;  %4537 = vmatprep.mubr.f32.mxu0 %v6546_v41 }
 0x2ca   :  { %4544 = vmatpush3.xpose.msra.mxu1 %v6751_v22  ;;  %4507 = vmatprep.subr.mxu0 %v8030_v13  ;;  %v8039_v22 = vand.u32 4294901760, %v8013_v8 }
 0x2cb   :  { %4545 = vmatprep.subr.mxu1 %v6774_v54  ;;  %v8042_v54 = vand.u32 4294901760, %v8017_v48 }
 0x2cd   :  { %4508 = vmatpush3.xpose.msra.mxu0 %v8031_v14 }
 0x2ce   :  { %4546 = vmatpush3.xpose.msra.mxu1 %v6780_v59  ;;  %4509 = vmatprep.subr.mxu0 %v8032_v34  ;;  %v8043_v59 = vand.u32 4294901760, %v8018_v27 }
 0x2cf   :  { %4547 = vmatprep.subr.mxu1 %v6806_v42  ;;  %v8046_v42 = vand.u32 4294901760, %v8020_v47 }
 0x2d1   :  { %4510 = vmatpush3.xpose.msra.mxu0 %v8033_v32 }
 0x2d2   :  { %4548 = vmatpush3.xpose.msra.mxu1 %v6812_v24  ;;  %4511 = vmatprep.subr.mxu0 %v8034_v57  ;;  %v8047_v24 = vld [vmem:[#allocation15_spill] sm:$0xff] }
 0x2d3   :  { %4549 = vmatprep.subr.mxu1 %v6837_v28  ;;  %v8050_v28 = vand.u32 4294901760, %v8022_v63 }
 0x2d5   :  { %4512 = vmatpush3.xpose.msra.mxu0 %v8035_v44 }
 0x2d6   :  { %4550 = vmatpush3.xpose.msra.mxu1 %v6843_v49  ;;  %4513 = vmatprep.subr.mxu0 %v8036_v36  ;;  %v8051_v49 = vand.u32 4294901760, %v8023_v7 }
 0x2d7   :  { %4551 = vmatprep.subr.mxu1 %v6860_v23  ;;  %v8054_v23 = vand.u32 4294901760, %v8026_v21  ;;  %v2348_v21 = vpop.f32.mrf.mxu1 }
 0x2d9   :  { %4514 = vmatpush3.xpose.msra.mxu0 %v8037_v40 }
 0x2da   :  { %4552 = vmatpush3.xpose.msra.mxu1 %v8011_v30  ;;  %4515 = vmatprep.subr.mxu0 %v8038_v26 }
 0x2db   :  { %4553 = vmatprep.subr.mxu1 %v6894_v12  ;;  %v2116_v12 = vpop.f32.mrf.mxu0 }
 0x2dd   :  { %4516 = vmatpush3.xpose.msra.mxu0 %v8039_v22 }
 0x2de   :  { %4554 = vmatpush3.xpose.msra.mxu1 %v6905_v52  ;;  %4517 = vmatprep.subr.mxu0 %v8040_v46  ;;  %v8056_v52 = vand.u32 4294901760, %v7090_v50  ;;  %v2350_v50 = vpop.f32.mrf.mxu1 }
 0x2df   :  { %4555 = vmatprep.subr.mxu1 %v8015_v43 }
 0x2e1   :  { %4518 = vmatpush3.xpose.msra.mxu0 %v8041_v55 }
 0x2e2   :  { %4556 = vmatpush3.xpose.msra.mxu1 %v6934_v3  ;;  %4519 = vmatprep.subr.mxu0 %v8042_v54  ;;  %v8058_v3 = vand.u32 4294901760, %v7115_v17 }
 0x2e3   :  { %4557 = vmatprep.subr.mxu1 %v6956_v19  ;;  %v8057_v19 = vand.u32 4294901760, %v7094_v5  ;;  %v8061_v5 = vand.u32 4294901760, %v7135_v62 }
 0x2e5   :  { %4520 = vmatpush3.xpose.msra.mxu0 %v8043_v59 }
 0x2e6   :  { %4558 = vmatpush3.xpose.msra.mxu1 %v6962_v51  ;;  %4521 = vmatprep.subr.mxu0 %v8044_v0  ;;  %v8052_v51 = vand.u32 4294901760, %v8024_v15 }
 0x2e7   :  { %4559 = vmatprep.subr.mxu1 %v8045_v2 }
 0x2e9   :  { %4522 = vmatpush3.xpose.msra.mxu0 %v8046_v42 }
 0x2ea   :  { %4560 = vmatpush3.xpose.msra.mxu1 %v8047_v24  ;;  %4523 = vmatprep.subr.mxu0 %v8048_v45  ;;  %v4642_v24 = vld [vmem:[%s7365_s2 + $0x10] sm:$0xff] }
 0x2eb   :  { %4561 = vmatprep.subr.mxu1 %v8049_v4 }
 0x2ed   :  { %4524 = vmatpush3.xpose.msra.mxu0 %v8050_v28  ;;  %v4643_v28 = vld [vmem:[%s7365_s2 + $0x18] sm:$0xff] }
 0x2ee   :  { %4562 = vmatpush3.xpose.msra.mxu1 %v7018_v10  ;;  %4525 = vmatprep.subr.mxu0 %v8051_v49  ;;  %v8055_v10 = vand.u32 4294901760, %v8027_v38 }
 0x2ef   :  { %4563 = vmatprep.subr.mxu1 %v7040_v37  ;;  %v2118_v37 = vpop.f32.mrf.mxu0 }
 0x2f0   :  { %v2351_v17 = vadd.f32 %v2350_v50, %v2118_v37 }
 0x2f1   :  { %4526 = vmatpush3.xpose.msra.mxu0 %v8052_v51  ;;  %v2485_v38 = vpop.f32.mrf.mxu0 }
 0x2f2   :  { %4564 = vmatpush3.xpose.msra.mxu1 %v7046_v11  ;;  %4527 = vmatprep.subr.mxu0 %v8053_v29  ;;  %v2349_v11 = vadd.f32 %v2348_v21, %v2116_v12 }
 0x2f3   :  { %4565 = vmatprep.subr.mxu1 %v7068_v58  ;;  %v2591_v58 = vpop.f32.mrf.mxu1 }
 0x2f4   :  { %v2486_v15 = vadd.f32 %v2485_v38, %v2349_v11 }
 0x2f5   :  { %4528 = vmatpush3.xpose.msra.mxu0 %v8054_v23 }
 0x2f6   :  { %4566 = vmatpush3.xpose.msra.mxu1 %v7074_v9  ;;  %4529 = vmatprep.subr.mxu0 %v8055_v10  ;;  %v8060_v9 = vand.u32 4294901760, %v8059_v53  ;;  %v2592_v7 = vadd.f32 %v2591_v58, %v2486_v15 }
 0x2f7   :  { %4567 = vmatprep.subr.mxu1 %v7096_v61  ;;  %v2487_v61 = vpop.f32.mrf.mxu0 }
 0x2f8   :  { %v2488_v35 = vadd.f32 %v2487_v61, %v2351_v17 }
 0x2f9   :  { %4530 = vmatpush3.xpose.msra.mxu0 %v8056_v52 }
 0x2fa   :  { %4568 = vmatpush3.xpose.msra.mxu1 %v7102_v18  ;;  %4531 = vmatprep.subr.mxu0 %v8057_v19  ;;  %v8062_v18 = vand.u32 4294901760, %v7142_v39  ;;  %v4640_v39 = vld [vmem:[%s7365_s2] sm:$0xff] }
 0x2fb   :  { %4569 = vmatprep.subr.mxu1 %v7124_v1  ;;  %v2593_v1 = vpop.f32.mrf.mxu1 }
 0x2fc   :  { %v2594_v62 = vadd.f32 %v2593_v1, %v2488_v35 }
 0x2fd   :  { %4532 = vmatpush3.xpose.msra.mxu0 %v8058_v3 }
 0x2fe   :  { %4570 = vmatpush3.xpose.msra.mxu1 %v7126_v25  ;;  %4533 = vmatprep.subr.mxu0 %v8060_v9  ;;  %v8063_v25 = vand.u32 4294901760, %v7151_v33  ;;  %v4641_v33 = vld [vmem:[%s7365_s2 + $0x8] sm:$0xff] }
 0x301   :  { %4572 = vmatmul.mubr.f32.vlgmr.msra.gmra.mxu1 %v6546_v41  ;;  %4534 = vmatpush3.xpose.msra.mxu0 %v8061_v5  ;;  %v2863_v63 = vpop.f32.mrf.mxu1 }
 0x302   :  { %4535 = vmatprep.subr.mxu0 %v8062_v18 }
 0x303   :  { %v2865_v43 = vpop.f32.mrf.mxu1 }
 0x305   :  { %4536 = vmatpush3.xpose.msra.mxu0 %v8063_v25 }
 0x308   :  { %v2759_v6 = vpop.f32.mrf.mxu0  ;;  %4538 = vmatmul.mubr.f32.vlgmr.msra.gmra.mxu0 %v6546_v41 }
 0x309   :  { %v2760_v30 = vadd.f32 %v2759_v6, %v2592_v7 }
 0x30a   :  { %v2761_v16 = vpop.f32.mrf.mxu0 }
 0x30b   :  { %v2864_v8 = vadd.f32 %v2863_v63, %v2760_v30  ;;  %v2762_v60 = vadd.f32 %v2761_v16, %v2594_v62 }
 0x30d   :  { %v3723_v31 = vmul.f32 %v4640_v39, %v2864_v8  ;;  %v2866_v48 = vadd.f32 %v2865_v43, %v2762_v60 }
 0x30f   :  { %3727 = vst [vmem:[#allocation3] sm:$0xff] %v3723_v31  ;;  %v3724_v27 = vmul.f32 %v4641_v33, %v2866_v48 }
 0x311   :  { %3728 = vst [vmem:[#allocation3 + $0x8] sm:$0xff] %v3724_v27 }
 0x341   :  { %v3203_v56 = vpop.f32.mrf.mxu1 }
 0x343   :  { %v3205_v13 = vpop.f32.mrf.mxu1 }
 0x348   :  { %v2971_v41 = vpop.f32.mrf.mxu0 }
 0x349   :  { %v3204_v14 = vadd.f32 %v3203_v56, %v2971_v41 }
 0x34a   :  { %v2973_v47 = vpop.f32.mrf.mxu0 }
 0x34b   :  { %v3206_v57 = vadd.f32 %v3205_v13, %v2973_v47 }
 0x381   :  { %v3446_v34 = vpop.f32.mrf.mxu1 }
 0x383   :  { %v3448_v40 = vpop.f32.mrf.mxu1 }
 0x388   :  { %v3340_v20 = vpop.f32.mrf.mxu0 }
 0x389   :  { %v3341_v44 = vadd.f32 %v3340_v20, %v3204_v14 }
 0x38a   :  { %v3342_v32 = vpop.f32.mrf.mxu0 }
 0x38b   :  { %v3343_v36 = vadd.f32 %v3342_v32, %v3206_v57  ;;  %v3447_v26 = vadd.f32 %v3446_v34, %v3341_v44 }
 0x38d   :  { %v3449_v54 = vadd.f32 %v3448_v40, %v3343_v36 }
 0x3c1   :  { %v3718_v22 = vpop.f32.mrf.mxu1 }
 0x3c3   :  { %v3720_v42 = vpop.f32.mrf.mxu1 }
 0x3c8   :  { %v3614_v46 = vpop.f32.mrf.mxu0 }
 0x3c9   :  { %v3615_v55 = vadd.f32 %v3614_v46, %v3447_v26 }
 0x3ca   :  { %v3616_v59 = vpop.f32.mrf.mxu0 }
 0x3cb   :  { %v3719_v0 = vadd.f32 %v3718_v22, %v3615_v55  ;;  %v3617_v2 = vadd.f32 %v3616_v59, %v3449_v54 }
 0x3cd   :  { %v3725_v45 = vmul.f32 %v4642_v24, %v3719_v0  ;;  %v3721_v4 = vadd.f32 %v3720_v42, %v3617_v2 }
 0x3cf   :  { %3729 = vst [vmem:[#allocation3 + $0x10] sm:$0xff] %v3725_v45  ;;  %v3726_v49 = vmul.f32 %v4643_v28, %v3721_v4 }
 0x3d1   :  { %3730 = vst [vmem:[#allocation3 + $0x18] sm:$0xff] %v3726_v49 }
 0x3d2   :  { %4655 = shalt.err (!%p4652_p4)
}
 0x3d3   :  { %3740 = dma.vmem_to_hbm [thread:$0]  %s3738_s9, 512, %s7366_s3, [#allocation4]  }
 0x3d4   :  { %4664 = dma.done.wait [#allocation4], 512  }
 0x3d5   :  { %4665 = vsyncadd [#allocation4], 4294966784 }
 0x3d6   :  { %3744 = vsyncpa [#allocation4], 1 }

</bundles_post_ra>
